<compile_context>
chip_gen: v7x
topology: tpu7x:2x2x1
jax: 0.10.0
libtpu: 0.0.40
codegen_flags: <defaults>
</compile_context>

<pallas_src>
import math
from functools import partial

import jax
import jax.numpy as jnp
from jax.experimental import pallas as pl
from jax.experimental.pallas import tpu as pltpu


# MXU input dtype (fp32 accumulation everywhere). Set to jnp.float32 for
# bitwise-closer parity with the fp32 PyTorch reference (slower on the MXU).
MATMUL_DTYPE = jnp.bfloat16
LN_EPS = 1e-5

# Row order of the packed per-layer (n_layers, 6, E) fp32 vector bundle.
_VEC_BO, _VEC_B2, _VEC_LN1W, _VEC_LN1B, _VEC_LN2W, _VEC_LN2B = range(6)


def _layer_norm(h, w, b, eps):
    mu = jnp.mean(h, axis=-1, keepdims=True)
    var = jnp.mean(jnp.square(h - mu), axis=-1, keepdims=True)
    return (h - mu) * jax.lax.rsqrt(var + eps) * w + b


# ----------------------------- fused kernel ----------------------------------

def fused_encoder_kernel(x_ref, conv_wt_ref, wqkv_ref, wo_ref, w1_ref, w2_ref,
                         bqkv_ref, b1_ref, vec_ref, o_ref, act_ref,
                         *, block_batches, seq, n_head, head_dim, eps):
    layer = pl.program_id(1)
    n_layers = pl.num_programs(1)
    rows = block_batches * seq
    e = n_head * head_dim
    mm = wqkv_ref.dtype                         # MXU input dtype

    def vec(i):                                 # (1, E) fp32 row of the packed bundle
        return vec_ref[0, i:i + 1, :]

    # ---- layer 0 only: Conv1d(k=1, bias=False) == per-token linear embedding ----
    @pl.when(layer == 0)
    def _():
        x_in = x_ref[...].reshape(rows, x_ref.shape[-1])
        act_ref[...] = jnp.dot(x_in.astype(conv_wt_ref.dtype), conv_wt_ref[...],
                               preferred_element_type=jnp.float32)

    x = act_ref[...]                            # (rows, E) fp32 residual stream
    xm = x.astype(mm)

    # ---- fused QKV projection: one (rows, E) x (E, 3E) MXU matmul ---------------
    qkv = (jnp.dot(xm, wqkv_ref[0], preferred_element_type=jnp.float32)
           + bqkv_ref[0, :, :])
    scale = 1.0 / math.sqrt(head_dim)
    qm = (qkv[:, :e] * scale).astype(mm)        # fold softmax scale into q (fp32), then bf16
    km = qkv[:, e:2 * e].astype(mm)
    vm = qkv[:, 2 * e:].astype(mm)

    # ---- multi-head self-attention along the sequence axis within each batch ----
    # TODO(synk): fold the per-head loop into a single batched-head einsum once
    # Mosaic dot_general supports multiple batch dims; lane slices + concat is
    # the robust formulation today (bf16 MXU inputs, fp32 softmax/accumulation).
    head_outs = []
    for h in range(n_head):                     # static, small
        cs = slice(h * head_dim, (h + 1) * head_dim)
        qh = qm[:, cs].reshape(block_batches, seq, head_dim)
        kh = km[:, cs].reshape(block_batches, seq, head_dim)
        vh = vm[:, cs].reshape(block_batches, seq, head_dim)
        s = jnp.einsum('bqd,bkd->bqk', qh, kh,
                       preferred_element_type=jnp.float32)
        s = s - jnp.max(s, axis=-1, keepdims=True)
        p = jnp.exp(s)
        p = p * pl.reciprocal(jnp.sum(p, axis=-1, keepdims=True), approx=True)
        oh = jnp.einsum('bqk,bkd->bqd', p.astype(mm), vh,
                        preferred_element_type=jnp.float32)
        head_outs.append(oh.reshape(rows, head_dim))
    attn = jnp.concatenate(head_outs, axis=-1)  # (rows, E)
    attn = (jnp.dot(attn.astype(mm), wo_ref[0], preferred_element_type=jnp.float32)
            + vec(_VEC_BO))

    # ---- residual + LayerNorm 1 (post-norm: PyTorch default norm_first=False) ----
    h1 = _layer_norm(x + attn, vec(_VEC_LN1W), vec(_VEC_LN1B), eps)

    # ---- feed-forward (ReLU; dropout is identity in eval mode) -------------------
    f = (jnp.dot(h1.astype(mm), w1_ref[0], preferred_element_type=jnp.float32)
         + b1_ref[0, :, :])
    f = jnp.maximum(f, 0.0)
    f = (jnp.dot(f.astype(mm), w2_ref[0], preferred_element_type=jnp.float32)
         + vec(_VEC_B2))

    # ---- residual + LayerNorm 2 ---------------------------------------------------
    h2 = _layer_norm(h1 + f, vec(_VEC_LN2W), vec(_VEC_LN2B), eps)
    act_ref[...] = h2                           # carry to next layer step

    # ---- final layer: emit only the last sequence position of each batch ---------
    @pl.when(layer == n_layers - 1)
    def _():
        last = h2.reshape(block_batches, seq, e)[:, seq - 1, :]
        o_ref[0] = last.astype(o_ref.dtype)


# ----------------------------- block sizing ------------------------------------

def _vmem_limit_bytes():
    cap = 64 << 20                              # conservative fallback (v7x per-TC VMEM)
    try:
        cap = int(getattr(pltpu.get_tpu_info(), "vmem_capacity_bytes", cap))
    except Exception:
        pass
    # Leave the compiler headroom: ~100 MiB on 128-MiB parts (v5e/v6e),
    # ~48 MiB on 64-MiB parts (v7x).
    return int(min(100 << 20, (cap * 3) // 4))


def _pick_block_batches(n_batch, seq, cin, e, dff, vmem_budget, w_bytes,
                        max_rows=2048):
    """Largest per-block batch count whose working set fits the VMEM budget."""
    def need(bb):
        rows = bb * seq
        return (w_bytes                          # double-buffered weight stream
                + rows * e * 4                   # fp32 residual scratch
                + 2 * rows * cin * 4             # double-buffered input tile
                + 2 * bb * e * 4                 # double-buffered output tile
                + rows * 3 * e * 6               # qkv fp32 + bf16 copies
                + 2 * bb * seq * seq * 4         # one head's scores + probs
                + rows * dff * 6                 # FFN intermediate fp32 + bf16
                + 4 * rows * e * 4)              # attn / h1 / h2 / misc temps

    divisors = [d for d in range(1, n_batch + 1) if n_batch % d == 0]
    feasible = [bb for bb in divisors
                if bb * seq <= max(seq, max_rows) and need(bb) <= vmem_budget]
    if not feasible:
        # TODO(synk): flash-style (online-softmax) kv tiling for long sequences.
        raise ValueError(
            f"seq={seq} / dff={dff} working set exceeds the VMEM budget "
            f"({vmem_budget} bytes); needs kv-tiled attention.")
    bb = max(feasible)   # fewest batch blocks -> layer weights streamed fewest times
    # Keep >=2 batch blocks for dual-TensorCore chips (v7x) only when each
    # half-block is still comfortably compute-bound (rows >= 1024).
    if n_batch // bb == 1 and n_batch % 2 == 0 and (n_batch // 2) * seq >= 1024:
        bb = n_batch // 2
    return bb


# ----------------------------- wrapper ------------------------------------------

def transformer_encoder_forward(x, params, *, n_head):
    """x: (N, L, input_dim) -> (N, dim)   (== PyTorch `transformer(...)[-1]`)."""
    n_batch, seq, cin = x.shape
    e = params["conv_wt"].shape[-1]
    n_layers = params["wqkv_t"].shape[0]
    dff = params["w1_t"].shape[-1]
    head_dim = e // n_head
    assert n_head * head_dim == e

    w_itemsize = jnp.dtype(params["wqkv_t"].dtype).itemsize
    w_bytes = (2 * w_itemsize * (3 * e * e + e * e + 2 * e * dff + cin * e)
               + 2 * 4 * (3 * e + dff + 6 * e))          # 2x-buffered weights + vectors
    vmem_limit = _vmem_limit_bytes()
    bb = _pick_block_batches(n_batch, seq, cin, e, dff, vmem_limit, w_bytes)
    num_blocks = n_batch // bb

    kernel = partial(fused_encoder_kernel, block_batches=bb, seq=seq,
                     n_head=n_head, head_dim=head_dim, eps=LN_EPS)

    def per_layer(shape):
        return pl.BlockSpec((1,) + shape, lambda b, l: (l, 0, 0))

    grid_spec = pltpu.PrefetchScalarGridSpec(
        num_scalar_prefetch=0,
        grid=(num_blocks, n_layers),
        in_specs=[
            pl.BlockSpec((bb, seq, cin), lambda b, l: (b, 0, 0)),   # x (raw input)
            pl.BlockSpec((cin, e), lambda b, l: (0, 0)),            # conv weight (Cin, E)
            per_layer((e, 3 * e)),                                  # wqkv  (fused q|k|v)
            per_layer((e, e)),                                      # wo
            per_layer((e, dff)),                                    # w1
            per_layer((dff, e)),                                    # w2
            per_layer((1, 3 * e)),                                  # bqkv
            per_layer((1, dff)),                                    # b1
            per_layer((6, e)),                                      # [bo,b2,ln1w,ln1b,ln2w,ln2b]
        ],
        out_specs=pl.BlockSpec((1, bb, e), lambda b, l: (b, 0, 0)),
        scratch_shapes=[pltpu.VMEM((bb * seq, e), jnp.float32)],
    )

    out = pl.pallas_call(
        kernel,
        out_shape=jax.ShapeDtypeStruct((num_blocks, bb, e), jnp.float32),
        grid_spec=grid_spec,
        compiler_params=pltpu.CompilerParams(
            dimension_semantics=("parallel", "arbitrary"),
            vmem_limit_bytes=vmem_limit),
    )(x, params["conv_wt"], params["wqkv_t"], params["wo_t"],
      params["w1_t"], params["w2_t"], params["bqkv"], params["b1"],
      params["vec_e"])
    return out.reshape(n_batch, e)


# ----------------------------- params --------------------------------------------

def init_params(key, input_dim, dim, n_layers, dim_feedforward=2048,
                matmul_dtype=MATMUL_DTYPE):
    keys = jax.random.split(key, 1 + n_layers)
    # Conv1d weight is (E, Cin, 1); drop the kernel dim, pre-transpose -> (Cin, E)
    conv_w = 0.1 * jax.random.normal(keys[0], (dim, input_dim), jnp.float32)

    wqkv, wo, w1, w2 = [], [], [], []
    bqkv, b1, vec_e = [], [], []
    ln_w = jnp.ones((dim,), jnp.float32)
    ln_b = jnp.zeros((dim,), jnp.float32)
    for i in range(n_layers):
        ks = jax.random.split(keys[1 + i], 8)
        in_proj_w = 0.1 * jax.random.normal(ks[0], (3 * dim, dim), jnp.float32)
        in_proj_b = 0.05 * jax.random.normal(ks[1], (3 * dim,), jnp.float32)
        wo_i = 0.1 * jax.random.normal(ks[2], (dim, dim), jnp.float32)
        bo_i = 0.05 * jax.random.normal(ks[3], (dim,), jnp.float32)
        w1_i = 0.1 * jax.random.normal(ks[4], (dim_feedforward, dim), jnp.float32)
        b1_i = 0.05 * jax.random.normal(ks[5], (dim_feedforward,), jnp.float32)
        w2_i = 0.1 * jax.random.normal(ks[6], (dim, dim_feedforward), jnp.float32)
        b2_i = 0.05 * jax.random.normal(ks[7], (dim,), jnp.float32)
        # the kernel computes x @ W^T, so store pre-transposed weights
        wqkv.append(in_proj_w.T)                 # (E, 3E), columns ordered [q | k | v]
        wo.append(wo_i.T); w1.append(w1_i.T); w2.append(w2_i.T)
        bqkv.append(in_proj_b[None, :])          # (1, 3E)
        b1.append(b1_i[None, :])                 # (1, dff)
        vec_e.append(jnp.stack([bo_i, b2_i, ln_w, ln_b, ln_w, ln_b]))  # (6, E)

    return {
        "conv_wt": conv_w.T.astype(matmul_dtype),              # (Cin, E)
        "wqkv_t": jnp.stack(wqkv).astype(matmul_dtype),        # (L, E, 3E)
        "wo_t": jnp.stack(wo).astype(matmul_dtype),            # (L, E, E)
        "w1_t": jnp.stack(w1).astype(matmul_dtype),            # (L, E, dff)
        "w2_t": jnp.stack(w2).astype(matmul_dtype),            # (L, dff, E)
        "bqkv": jnp.stack(bqkv).astype(jnp.float32),           # (L, 1, 3E)
        "b1": jnp.stack(b1).astype(jnp.float32),               # (L, 1, dff)
        "vec_e": jnp.stack(vec_e).astype(jnp.float32),         # (L, 6, E)
    }


# ----------------------------- main -----------------------------------------------

if __name__ == "__main__":
    # Transformer_Encoder(input_dim=4, dim=32, n_head=4, n_layers=2); x: (N, L, input_dim)
    N, L, INPUT_DIM = 2, 8, 4
    DIM, N_HEAD, N_LAYERS = 32, 4, 2

    key = jax.random.PRNGKey(0)
    kx, kp = jax.random.split(key)
    x = jax.random.normal(kx, (N, L, INPUT_DIM), jnp.float32)
    params = init_params(kp, INPUT_DIM, DIM, N_LAYERS)

    out = transformer_encoder_forward(x, params, n_head=N_HEAD)
    out = jax.block_until_ready(out)
    assert out.shape == (N, DIM), out.shape
    assert bool(jnp.all(jnp.isfinite(out)))
    print("KERNEL_OK")
</pallas_src>

<mosaic_0001>
module attributes {stable_mosaic.version = 11 : i64} {
  func.func @fused_encoder_kernel(%arg0: i32, %arg1: i32, %arg2: memref<2x8x4xf32, #tpu.memory_space<vmem>>, %arg3: memref<4x32xbf16, #tpu.memory_space<vmem>>, %arg4: memref<1x32x96xbf16, #tpu.memory_space<vmem>>, %arg5: memref<1x32x32xbf16, #tpu.memory_space<vmem>>, %arg6: memref<1x32x2048xbf16, #tpu.memory_space<vmem>>, %arg7: memref<1x2048x32xbf16, #tpu.memory_space<vmem>>, %arg8: memref<1x1x96xf32, #tpu.memory_space<vmem>>, %arg9: memref<1x1x2048xf32, #tpu.memory_space<vmem>>, %arg10: memref<1x6x32xf32, #tpu.memory_space<vmem>>, %arg11: memref<1x2x32xf32, #tpu.memory_space<vmem>>, %arg12: memref<16x32xf32, #tpu.memory_space<vmem>>) attributes {dimension_semantics = [#tpu.dimension_semantics<parallel>, #tpu.dimension_semantics<arbitrary>], iteration_bounds = array<i64: 1, 2>, scalar_prefetch = 0 : i64, scratch_operands = 1 : i64, tpu.core_type = #tpu.core_type<tc>, window_params = [{transform_indices = @transform_0, window_bounds = array<i64: 2, 8, 4>}, {pipeline_mode = #tpu.pipeline_mode<synchronous>, transform_indices = @transform_1, window_bounds = array<i64: 4, 32>}, {transform_indices = @transform_2, window_bounds = array<i64: 1, 32, 96>}, {transform_indices = @transform_3, window_bounds = array<i64: 1, 32, 32>}, {transform_indices = @transform_4, window_bounds = array<i64: 1, 32, 2048>}, {transform_indices = @transform_5, window_bounds = array<i64: 1, 2048, 32>}, {transform_indices = @transform_6, window_bounds = array<i64: 1, 1, 96>}, {transform_indices = @transform_7, window_bounds = array<i64: 1, 1, 2048>}, {transform_indices = @transform_8, window_bounds = array<i64: 1, 6, 32>}, {transform_indices = @transform_9, window_bounds = array<i64: 1, 2, 32>}]} {
    %c0_i32 = arith.constant 0 : i32
    %0 = arith.cmpi eq, %arg1, %c0_i32 : i32
    %1 = arith.extui %0 : i1 to i32
    %c0_i32_0 = arith.constant 0 : i32
    %2 = arith.cmpi ne, %1, %c0_i32_0 : i32
    scf.if %2 {
      %c0_67 = arith.constant 0 : index
      %c0_68 = arith.constant 0 : index
      %c0_69 = arith.constant 0 : index
      %185 = vector.load %arg2[%c0_67, %c0_68, %c0_69] : memref<2x8x4xf32, #tpu.memory_space<vmem>>, vector<2x8x4xf32>
      %186 = vector.shape_cast %185 : vector<2x8x4xf32> to vector<16x4xf32>
      %187 = arith.truncf %186 : vector<16x4xf32> to vector<16x4xbf16>
      %c0_70 = arith.constant 0 : index
      %c0_71 = arith.constant 0 : index
      %188 = vector.load %arg3[%c0_70, %c0_71] : memref<4x32xbf16, #tpu.memory_space<vmem>>, vector<4x32xbf16>
      %cst_72 = arith.constant dense<0.000000e+00> : vector<16x32xf32>
      %189 = tpu.matmul %187, %188, %cst_72 {dimension_numbers = #tpu.dot_dimension_numbers<[1], [0], [0], [1], [0, 0, 1, 1], [], []>} : vector<16x4xbf16>, vector<4x32xbf16>, vector<16x32xf32> -> vector<16x32xf32>
      %c0_73 = arith.constant 0 : index
      %c0_74 = arith.constant 0 : index
      %190 = vector.load %arg12[%c0_73, %c0_74] : memref<16x32xf32, #tpu.memory_space<vmem>>, vector<16x32xf32>
      tpu.vector_store %arg12[%c0_73, %c0_74], %189 {strides = array<i32>} : memref<16x32xf32, #tpu.memory_space<vmem>>, vector<16x32xf32>,
    } else {
    }
    %c0 = arith.constant 0 : index
    %c0_1 = arith.constant 0 : index
    %3 = vector.load %arg12[%c0, %c0_1] : memref<16x32xf32, #tpu.memory_space<vmem>>, vector<16x32xf32>
    %4 = arith.truncf %3 : vector<16x32xf32> to vector<16x32xbf16>
    %c0_2 = arith.constant 0 : index
    %c0_3 = arith.constant 0 : index
    %c0_4 = arith.constant 0 : index
    %5 = vector.load %arg4[%c0_2, %c0_3, %c0_4] : memref<1x32x96xbf16, #tpu.memory_space<vmem>>, vector<1x32x96xbf16>
    %6 = vector.shape_cast %5 : vector<1x32x96xbf16> to vector<32x96xbf16>
    %cst = arith.constant dense<0.000000e+00> : vector<16x96xf32>
    %7 = tpu.matmul %4, %6, %cst {dimension_numbers = #tpu.dot_dimension_numbers<[1], [0], [0], [1], [0, 0, 1, 1], [], []>} : vector<16x32xbf16>, vector<32x96xbf16>, vector<16x96xf32> -> vector<16x96xf32>
    %c0_5 = arith.constant 0 : index
    %c0_6 = arith.constant 0 : index
    %c0_7 = arith.constant 0 : index
    %8 = vector.load %arg8[%c0_5, %c0_6, %c0_7] : memref<1x1x96xf32, #tpu.memory_space<vmem>>, vector<1x1x96xf32>
    %9 = vector.shape_cast %8 : vector<1x1x96xf32> to vector<1x96xf32>
    %10 = vector.broadcast %9 : vector<1x96xf32> to vector<16x96xf32>
    %11 = arith.addf %7, %10 : vector<16x96xf32>
    %12 = vector.extract_strided_slice %11 {offsets = [0, 0], sizes = [16, 32], strides = [1, 1]} : vector<16x96xf32> to vector<16x32xf32>
    %cst_8 = arith.constant 0.353553385 : f32
    %13 = vector.broadcast %cst_8 : f32 to vector<16x32xf32>
    %14 = arith.mulf %12, %13 : vector<16x32xf32>
    %15 = arith.truncf %14 : vector<16x32xf32> to vector<16x32xbf16>
    %16 = vector.extract_strided_slice %11 {offsets = [0, 32], sizes = [16, 32], strides = [1, 1]} : vector<16x96xf32> to vector<16x32xf32>
    %17 = arith.truncf %16 : vector<16x32xf32> to vector<16x32xbf16>
    %18 = vector.extract_strided_slice %11 {offsets = [0, 64], sizes = [16, 32], strides = [1, 1]} : vector<16x96xf32> to vector<16x32xf32>
    %19 = arith.truncf %18 : vector<16x32xf32> to vector<16x32xbf16>
    %20 = vector.extract_strided_slice %15 {offsets = [0, 0], sizes = [16, 8], strides = [1, 1]} : vector<16x32xbf16> to vector<16x8xbf16>
    %21 = vector.shape_cast %20 : vector<16x8xbf16> to vector<2x8x8xbf16>
    %22 = vector.extract_strided_slice %17 {offsets = [0, 0], sizes = [16, 8], strides = [1, 1]} : vector<16x32xbf16> to vector<16x8xbf16>
    %23 = vector.shape_cast %22 : vector<16x8xbf16> to vector<2x8x8xbf16>
    %24 = vector.extract_strided_slice %19 {offsets = [0, 0], sizes = [16, 8], strides = [1, 1]} : vector<16x32xbf16> to vector<16x8xbf16>
    %25 = vector.shape_cast %24 : vector<16x8xbf16> to vector<2x8x8xbf16>
    "tpu.trace_start"() <{level = 10 : i32, message = "bqd,bkd->bqk"}> : () -> ()
    %cst_9 = arith.constant dense<0.000000e+00> : vector<2x8x8xf32>
    %26 = tpu.matmul %21, %23, %cst_9 {dimension_numbers = #tpu.dot_dimension_numbers<[2], [2], [1], [1], [0, 0, 0, 1, 1, 1], [0], [0]>} : vector<2x8x8xbf16>, vector<2x8x8xbf16>, vector<2x8x8xf32> -> vector<2x8x8xf32>
    "tpu.trace_stop"() : () -> ()
    %cst_10 = arith.constant dense<0xFF800000> : vector<2x8xf32>
    %27 = vector.multi_reduction <maximumf>, %26, %cst_10 [2] : vector<2x8x8xf32> to vector<2x8xf32>
    %28 = vector.shape_cast %27 : vector<2x8xf32> to vector<2x8x1xf32>
    %29 = vector.broadcast %28 : vector<2x8x1xf32> to vector<2x8x8xf32>
    %30 = arith.subf %26, %29 : vector<2x8x8xf32>
    %31 = math.exp %30 : vector<2x8x8xf32>
    %cst_11 = arith.constant dense<0.000000e+00> : vector<2x8xf32>
    %32 = vector.multi_reduction <add>, %31, %cst_11 [2] : vector<2x8x8xf32> to vector<2x8xf32>
    %33 = vector.shape_cast %32 : vector<2x8xf32> to vector<2x8x1xf32>
    %34 = tpu.reciprocal %33 {approx = true} : vector<2x8x1xf32> -> vector<2x8x1xf32>
    %35 = vector.broadcast %34 : vector<2x8x1xf32> to vector<2x8x8xf32>
    %36 = arith.mulf %31, %35 : vector<2x8x8xf32>
    %37 = arith.truncf %36 : vector<2x8x8xf32> to vector<2x8x8xbf16>
    "tpu.trace_start"() <{level = 10 : i32, message = "bqk,bkd->bqd"}> : () -> ()
    %cst_12 = arith.constant dense<0.000000e+00> : vector<2x8x8xf32>
    %38 = tpu.matmul %37, %25, %cst_12 {dimension_numbers = #tpu.dot_dimension_numbers<[2], [1], [1], [2], [0, 0, 0, 1, 1, 2], [0], [0]>} : vector<2x8x8xbf16>, vector<2x8x8xbf16>, vector<2x8x8xf32> -> vector<2x8x8xf32>
    "tpu.trace_stop"() : () -> ()
    %39 = vector.shape_cast %38 : vector<2x8x8xf32> to vector<16x8xf32>
    %40 = vector.extract_strided_slice %15 {offsets = [0, 8], sizes = [16, 8], strides = [1, 1]} : vector<16x32xbf16> to vector<16x8xbf16>
    %41 = vector.shape_cast %40 : vector<16x8xbf16> to vector<2x8x8xbf16>
    %42 = vector.extract_strided_slice %17 {offsets = [0, 8], sizes = [16, 8], strides = [1, 1]} : vector<16x32xbf16> to vector<16x8xbf16>
    %43 = vector.shape_cast %42 : vector<16x8xbf16> to vector<2x8x8xbf16>
    %44 = vector.extract_strided_slice %19 {offsets = [0, 8], sizes = [16, 8], strides = [1, 1]} : vector<16x32xbf16> to vector<16x8xbf16>
    %45 = vector.shape_cast %44 : vector<16x8xbf16> to vector<2x8x8xbf16>
    "tpu.trace_start"() <{level = 10 : i32, message = "bqd,bkd->bqk"}> : () -> ()
    %cst_13 = arith.constant dense<0.000000e+00> : vector<2x8x8xf32>
    %46 = tpu.matmul %41, %43, %cst_13 {dimension_numbers = #tpu.dot_dimension_numbers<[2], [2], [1], [1], [0, 0, 0, 1, 1, 1], [0], [0]>} : vector<2x8x8xbf16>, vector<2x8x8xbf16>, vector<2x8x8xf32> -> vector<2x8x8xf32>
    "tpu.trace_stop"() : () -> ()
    %cst_14 = arith.constant dense<0xFF800000> : vector<2x8xf32>
    %47 = vector.multi_reduction <maximumf>, %46, %cst_14 [2] : vector<2x8x8xf32> to vector<2x8xf32>
    %48 = vector.shape_cast %47 : vector<2x8xf32> to vector<2x8x1xf32>
    %49 = vector.broadcast %48 : vector<2x8x1xf32> to vector<2x8x8xf32>
    %50 = arith.subf %46, %49 : vector<2x8x8xf32>
    %51 = math.exp %50 : vector<2x8x8xf32>
    %cst_15 = arith.constant dense<0.000000e+00> : vector<2x8xf32>
    %52 = vector.multi_reduction <add>, %51, %cst_15 [2] : vector<2x8x8xf32> to vector<2x8xf32>
    %53 = vector.shape_cast %52 : vector<2x8xf32> to vector<2x8x1xf32>
    %54 = tpu.reciprocal %53 {approx = true} : vector<2x8x1xf32> -> vector<2x8x1xf32>
    %55 = vector.broadcast %54 : vector<2x8x1xf32> to vector<2x8x8xf32>
    %56 = arith.mulf %51, %55 : vector<2x8x8xf32>
    %57 = arith.truncf %56 : vector<2x8x8xf32> to vector<2x8x8xbf16>
    "tpu.trace_start"() <{level = 10 : i32, message = "bqk,bkd->bqd"}> : () -> ()
    %cst_16 = arith.constant dense<0.000000e+00> : vector<2x8x8xf32>
    %58 = tpu.matmul %57, %45, %cst_16 {dimension_numbers = #tpu.dot_dimension_numbers<[2], [1], [1], [2], [0, 0, 0, 1, 1, 2], [0], [0]>} : vector<2x8x8xbf16>, vector<2x8x8xbf16>, vector<2x8x8xf32> -> vector<2x8x8xf32>
    "tpu.trace_stop"() : () -> ()
    %59 = vector.shape_cast %58 : vector<2x8x8xf32> to vector<16x8xf32>
    %60 = vector.extract_strided_slice %15 {offsets = [0, 16], sizes = [16, 8], strides = [1, 1]} : vector<16x32xbf16> to vector<16x8xbf16>
    %61 = vector.shape_cast %60 : vector<16x8xbf16> to vector<2x8x8xbf16>
    %62 = vector.extract_strided_slice %17 {offsets = [0, 16], sizes = [16, 8], strides = [1, 1]} : vector<16x32xbf16> to vector<16x8xbf16>
    %63 = vector.shape_cast %62 : vector<16x8xbf16> to vector<2x8x8xbf16>
    %64 = vector.extract_strided_slice %19 {offsets = [0, 16], sizes = [16, 8], strides = [1, 1]} : vector<16x32xbf16> to vector<16x8xbf16>
    %65 = vector.shape_cast %64 : vector<16x8xbf16> to vector<2x8x8xbf16>
    "tpu.trace_start"() <{level = 10 : i32, message = "bqd,bkd->bqk"}> : () -> ()
    %cst_17 = arith.constant dense<0.000000e+00> : vector<2x8x8xf32>
    %66 = tpu.matmul %61, %63, %cst_17 {dimension_numbers = #tpu.dot_dimension_numbers<[2], [2], [1], [1], [0, 0, 0, 1, 1, 1], [0], [0]>} : vector<2x8x8xbf16>, vector<2x8x8xbf16>, vector<2x8x8xf32> -> vector<2x8x8xf32>
    "tpu.trace_stop"() : () -> ()
    %cst_18 = arith.constant dense<0xFF800000> : vector<2x8xf32>
    %67 = vector.multi_reduction <maximumf>, %66, %cst_18 [2] : vector<2x8x8xf32> to vector<2x8xf32>
    %68 = vector.shape_cast %67 : vector<2x8xf32> to vector<2x8x1xf32>
    %69 = vector.broadcast %68 : vector<2x8x1xf32> to vector<2x8x8xf32>
    %70 = arith.subf %66, %69 : vector<2x8x8xf32>
    %71 = math.exp %70 : vector<2x8x8xf32>
    %cst_19 = arith.constant dense<0.000000e+00> : vector<2x8xf32>
    %72 = vector.multi_reduction <add>, %71, %cst_19 [2] : vector<2x8x8xf32> to vector<2x8xf32>
    %73 = vector.shape_cast %72 : vector<2x8xf32> to vector<2x8x1xf32>
    %74 = tpu.reciprocal %73 {approx = true} : vector<2x8x1xf32> -> vector<2x8x1xf32>
    %75 = vector.broadcast %74 : vector<2x8x1xf32> to vector<2x8x8xf32>
    %76 = arith.mulf %71, %75 : vector<2x8x8xf32>
    %77 = arith.truncf %76 : vector<2x8x8xf32> to vector<2x8x8xbf16>
    "tpu.trace_start"() <{level = 10 : i32, message = "bqk,bkd->bqd"}> : () -> ()
    %cst_20 = arith.constant dense<0.000000e+00> : vector<2x8x8xf32>
    %78 = tpu.matmul %77, %65, %cst_20 {dimension_numbers = #tpu.dot_dimension_numbers<[2], [1], [1], [2], [0, 0, 0, 1, 1, 2], [0], [0]>} : vector<2x8x8xbf16>, vector<2x8x8xbf16>, vector<2x8x8xf32> -> vector<2x8x8xf32>
    "tpu.trace_stop"() : () -> ()
    %79 = vector.shape_cast %78 : vector<2x8x8xf32> to vector<16x8xf32>
    %80 = vector.extract_strided_slice %15 {offsets = [0, 24], sizes = [16, 8], strides = [1, 1]} : vector<16x32xbf16> to vector<16x8xbf16>
    %81 = vector.shape_cast %80 : vector<16x8xbf16> to vector<2x8x8xbf16>
    %82 = vector.extract_strided_slice %17 {offsets = [0, 24], sizes = [16, 8], strides = [1, 1]} : vector<16x32xbf16> to vector<16x8xbf16>
    %83 = vector.shape_cast %82 : vector<16x8xbf16> to vector<2x8x8xbf16>
    %84 = vector.extract_strided_slice %19 {offsets = [0, 24], sizes = [16, 8], strides = [1, 1]} : vector<16x32xbf16> to vector<16x8xbf16>
    %85 = vector.shape_cast %84 : vector<16x8xbf16> to vector<2x8x8xbf16>
    "tpu.trace_start"() <{level = 10 : i32, message = "bqd,bkd->bqk"}> : () -> ()
    %cst_21 = arith.constant dense<0.000000e+00> : vector<2x8x8xf32>
    %86 = tpu.matmul %81, %83, %cst_21 {dimension_numbers = #tpu.dot_dimension_numbers<[2], [2], [1], [1], [0, 0, 0, 1, 1, 1], [0], [0]>} : vector<2x8x8xbf16>, vector<2x8x8xbf16>, vector<2x8x8xf32> -> vector<2x8x8xf32>
    "tpu.trace_stop"() : () -> ()
    %cst_22 = arith.constant dense<0xFF800000> : vector<2x8xf32>
    %87 = vector.multi_reduction <maximumf>, %86, %cst_22 [2] : vector<2x8x8xf32> to vector<2x8xf32>
    %88 = vector.shape_cast %87 : vector<2x8xf32> to vector<2x8x1xf32>
    %89 = vector.broadcast %88 : vector<2x8x1xf32> to vector<2x8x8xf32>
    %90 = arith.subf %86, %89 : vector<2x8x8xf32>
    %91 = math.exp %90 : vector<2x8x8xf32>
    %cst_23 = arith.constant dense<0.000000e+00> : vector<2x8xf32>
    %92 = vector.multi_reduction <add>, %91, %cst_23 [2] : vector<2x8x8xf32> to vector<2x8xf32>
    %93 = vector.shape_cast %92 : vector<2x8xf32> to vector<2x8x1xf32>
    %94 = tpu.reciprocal %93 {approx = true} : vector<2x8x1xf32> -> vector<2x8x1xf32>
    %95 = vector.broadcast %94 : vector<2x8x1xf32> to vector<2x8x8xf32>
    %96 = arith.mulf %91, %95 : vector<2x8x8xf32>
    %97 = arith.truncf %96 : vector<2x8x8xf32> to vector<2x8x8xbf16>
    "tpu.trace_start"() <{level = 10 : i32, message = "bqk,bkd->bqd"}> : () -> ()
    %cst_24 = arith.constant dense<0.000000e+00> : vector<2x8x8xf32>
    %98 = tpu.matmul %97, %85, %cst_24 {dimension_numbers = #tpu.dot_dimension_numbers<[2], [1], [1], [2], [0, 0, 0, 1, 1, 2], [0], [0]>} : vector<2x8x8xbf16>, vector<2x8x8xbf16>, vector<2x8x8xf32> -> vector<2x8x8xf32>
    "tpu.trace_stop"() : () -> ()
    %99 = vector.shape_cast %98 : vector<2x8x8xf32> to vector<16x8xf32>
    %100 = tpu.concatenate %39, %59, %79, %99 in 1 : vector<16x8xf32>, vector<16x8xf32>, vector<16x8xf32>, vector<16x8xf32> -> vector<16x32xf32>
    %101 = arith.truncf %100 : vector<16x32xf32> to vector<16x32xbf16>
    %c0_25 = arith.constant 0 : index
    %c0_26 = arith.constant 0 : index
    %c0_27 = arith.constant 0 : index
    %102 = vector.load %arg5[%c0_25, %c0_26, %c0_27] : memref<1x32x32xbf16, #tpu.memory_space<vmem>>, vector<1x32x32xbf16>
    %103 = vector.shape_cast %102 : vector<1x32x32xbf16> to vector<32x32xbf16>
    %cst_28 = arith.constant dense<0.000000e+00> : vector<16x32xf32>
    %104 = tpu.matmul %101, %103, %cst_28 {dimension_numbers = #tpu.dot_dimension_numbers<[1], [0], [0], [1], [0, 0, 1, 1], [], []>} : vector<16x32xbf16>, vector<32x32xbf16>, vector<16x32xf32> -> vector<16x32xf32>
    %c0_29 = arith.constant 0 : index
    %c0_30 = arith.constant 0 : index
    %c0_31 = arith.constant 0 : index
    %105 = vector.load %arg10[%c0_29, %c0_30, %c0_31] : memref<1x6x32xf32, #tpu.memory_space<vmem>>, vector<1x1x32xf32>
    %106 = vector.shape_cast %105 : vector<1x1x32xf32> to vector<1x32xf32>
    %107 = vector.broadcast %106 : vector<1x32xf32> to vector<16x32xf32>
    %108 = arith.addf %104, %107 : vector<16x32xf32>
    %109 = arith.addf %3, %108 : vector<16x32xf32>
    %c0_32 = arith.constant 0 : index
    %c2 = arith.constant 2 : index
    %c0_33 = arith.constant 0 : index
    %110 = vector.load %arg10[%c0_32, %c2, %c0_33] : memref<1x6x32xf32, #tpu.memory_space<vmem>>, vector<1x1x32xf32>
    %111 = vector.shape_cast %110 : vector<1x1x32xf32> to vector<1x32xf32>
    %c0_34 = arith.constant 0 : index
    %c3 = arith.constant 3 : index
    %c0_35 = arith.constant 0 : index
    %112 = vector.load %arg10[%c0_34, %c3, %c0_35] : memref<1x6x32xf32, #tpu.memory_space<vmem>>, vector<1x1x32xf32>
    %113 = vector.shape_cast %112 : vector<1x1x32xf32> to vector<1x32xf32>
    %cst_36 = arith.constant dense<0.000000e+00> : vector<16xf32>
    %114 = vector.multi_reduction <add>, %109, %cst_36 [1] : vector<16x32xf32> to vector<16xf32>
    %115 = vector.shape_cast %114 : vector<16xf32> to vector<16x1xf32>
    %cst_37 = arith.constant 3.200000e+01 : f32
    %116 = vector.broadcast %cst_37 : f32 to vector<16x1xf32>
    %117 = arith.divf %115, %116 : vector<16x1xf32>
    %118 = vector.broadcast %117 : vector<16x1xf32> to vector<16x32xf32>
    %119 = arith.subf %109, %118 : vector<16x32xf32>
    %120 = arith.mulf %119, %119 : vector<16x32xf32>
    %cst_38 = arith.constant dense<0.000000e+00> : vector<16xf32>
    %121 = vector.multi_reduction <add>, %120, %cst_38 [1] : vector<16x32xf32> to vector<16xf32>
    %122 = vector.shape_cast %121 : vector<16xf32> to vector<16x1xf32>
    %cst_39 = arith.constant 3.200000e+01 : f32
    %123 = vector.broadcast %cst_39 : f32 to vector<16x1xf32>
    %124 = arith.divf %122, %123 : vector<16x1xf32>
    %125 = vector.broadcast %117 : vector<16x1xf32> to vector<16x32xf32>
    %126 = arith.subf %109, %125 : vector<16x32xf32>
    %cst_40 = arith.constant 9.99999974E-6 : f32
    %127 = vector.broadcast %cst_40 : f32 to vector<16x1xf32>
    %128 = arith.addf %124, %127 : vector<16x1xf32>
    %129 = math.rsqrt %128 : vector<16x1xf32>
    %130 = vector.broadcast %129 : vector<16x1xf32> to vector<16x32xf32>
    %131 = arith.mulf %126, %130 : vector<16x32xf32>
    %132 = vector.broadcast %111 : vector<1x32xf32> to vector<16x32xf32>
    %133 = arith.mulf %131, %132 : vector<16x32xf32>
    %134 = vector.broadcast %113 : vector<1x32xf32> to vector<16x32xf32>
    %135 = arith.addf %133, %134 : vector<16x32xf32>
    %136 = arith.truncf %135 : vector<16x32xf32> to vector<16x32xbf16>
    %c0_41 = arith.constant 0 : index
    %c0_42 = arith.constant 0 : index
    %c0_43 = arith.constant 0 : index
    %137 = vector.load %arg6[%c0_41, %c0_42, %c0_43] : memref<1x32x2048xbf16, #tpu.memory_space<vmem>>, vector<1x32x2048xbf16>
    %138 = vector.shape_cast %137 : vector<1x32x2048xbf16> to vector<32x2048xbf16>
    %cst_44 = arith.constant dense<0.000000e+00> : vector<16x2048xf32>
    %139 = tpu.matmul %136, %138, %cst_44 {dimension_numbers = #tpu.dot_dimension_numbers<[1], [0], [0], [1], [0, 0, 1, 1], [], []>} : vector<16x32xbf16>, vector<32x2048xbf16>, vector<16x2048xf32> -> vector<16x2048xf32>
    %c0_45 = arith.constant 0 : index
    %c0_46 = arith.constant 0 : index
    %c0_47 = arith.constant 0 : index
    %140 = vector.load %arg9[%c0_45, %c0_46, %c0_47] : memref<1x1x2048xf32, #tpu.memory_space<vmem>>, vector<1x1x2048xf32>
    %141 = vector.shape_cast %140 : vector<1x1x2048xf32> to vector<1x2048xf32>
    %142 = vector.broadcast %141 : vector<1x2048xf32> to vector<16x2048xf32>
    %143 = arith.addf %139, %142 : vector<16x2048xf32>
    %cst_48 = arith.constant 0.000000e+00 : f32
    %144 = vector.broadcast %cst_48 : f32 to vector<16x2048xf32>
    %145 = arith.maximumf %143, %144 : vector<16x2048xf32>
    %146 = arith.truncf %145 : vector<16x2048xf32> to vector<16x2048xbf16>
    %c0_49 = arith.constant 0 : index
    %c0_50 = arith.constant 0 : index
    %c0_51 = arith.constant 0 : index
    %147 = vector.load %arg7[%c0_49, %c0_50, %c0_51] : memref<1x2048x32xbf16, #tpu.memory_space<vmem>>, vector<1x2048x32xbf16>
    %148 = vector.shape_cast %147 : vector<1x2048x32xbf16> to vector<2048x32xbf16>
    %cst_52 = arith.constant dense<0.000000e+00> : vector<16x32xf32>
    %149 = tpu.matmul %146, %148, %cst_52 {dimension_numbers = #tpu.dot_dimension_numbers<[1], [0], [0], [1], [0, 0, 1, 1], [], []>} : vector<16x2048xbf16>, vector<2048x32xbf16>, vector<16x32xf32> -> vector<16x32xf32>
    %c0_53 = arith.constant 0 : index
    %c1 = arith.constant 1 : index
    %c0_54 = arith.constant 0 : index
    %150 = vector.load %arg10[%c0_53, %c1, %c0_54] : memref<1x6x32xf32, #tpu.memory_space<vmem>>, vector<1x1x32xf32>
    %151 = vector.shape_cast %150 : vector<1x1x32xf32> to vector<1x32xf32>
    %152 = vector.broadcast %151 : vector<1x32xf32> to vector<16x32xf32>
    %153 = arith.addf %149, %152 : vector<16x32xf32>
    %154 = arith.addf %135, %153 : vector<16x32xf32>
    %c0_55 = arith.constant 0 : index
    %c4 = arith.constant 4 : index
    %c0_56 = arith.constant 0 : index
    %155 = vector.load %arg10[%c0_55, %c4, %c0_56] : memref<1x6x32xf32, #tpu.memory_space<vmem>>, vector<1x1x32xf32>
    %156 = vector.shape_cast %155 : vector<1x1x32xf32> to vector<1x32xf32>
    %c0_57 = arith.constant 0 : index
    %c5 = arith.constant 5 : index
    %c0_58 = arith.constant 0 : index
    %157 = vector.load %arg10[%c0_57, %c5, %c0_58] : memref<1x6x32xf32, #tpu.memory_space<vmem>>, vector<1x1x32xf32>
    %158 = vector.shape_cast %157 : vector<1x1x32xf32> to vector<1x32xf32>
    %cst_59 = arith.constant dense<0.000000e+00> : vector<16xf32>
    %159 = vector.multi_reduction <add>, %154, %cst_59 [1] : vector<16x32xf32> to vector<16xf32>
    %160 = vector.shape_cast %159 : vector<16xf32> to vector<16x1xf32>
    %cst_60 = arith.constant 3.200000e+01 : f32
    %161 = vector.broadcast %cst_60 : f32 to vector<16x1xf32>
    %162 = arith.divf %160, %161 : vector<16x1xf32>
    %163 = vector.broadcast %162 : vector<16x1xf32> to vector<16x32xf32>
    %164 = arith.subf %154, %163 : vector<16x32xf32>
    %165 = arith.mulf %164, %164 : vector<16x32xf32>
    %cst_61 = arith.constant dense<0.000000e+00> : vector<16xf32>
    %166 = vector.multi_reduction <add>, %165, %cst_61 [1] : vector<16x32xf32> to vector<16xf32>
    %167 = vector.shape_cast %166 : vector<16xf32> to vector<16x1xf32>
    %cst_62 = arith.constant 3.200000e+01 : f32
    %168 = vector.broadcast %cst_62 : f32 to vector<16x1xf32>
    %169 = arith.divf %167, %168 : vector<16x1xf32>
    %170 = vector.broadcast %162 : vector<16x1xf32> to vector<16x32xf32>
    %171 = arith.subf %154, %170 : vector<16x32xf32>
    %cst_63 = arith.constant 9.99999974E-6 : f32
    %172 = vector.broadcast %cst_63 : f32 to vector<16x1xf32>
    %173 = arith.addf %169, %172 : vector<16x1xf32>
    %174 = math.rsqrt %173 : vector<16x1xf32>
    %175 = vector.broadcast %174 : vector<16x1xf32> to vector<16x32xf32>
    %176 = arith.mulf %171, %175 : vector<16x32xf32>
    %177 = vector.broadcast %156 : vector<1x32xf32> to vector<16x32xf32>
    %178 = arith.mulf %176, %177 : vector<16x32xf32>
    %179 = vector.broadcast %158 : vector<1x32xf32> to vector<16x32xf32>
    %180 = arith.addf %178, %179 : vector<16x32xf32>
    %c0_64 = arith.constant 0 : index
    %c0_65 = arith.constant 0 : index
    %181 = vector.load %arg12[%c0_64, %c0_65] : memref<16x32xf32, #tpu.memory_space<vmem>>, vector<16x32xf32>
    tpu.vector_store %arg12[%c0_64, %c0_65], %180 {strides = array<i32>} : memref<16x32xf32, #tpu.memory_space<vmem>>, vector<16x32xf32>,
    %c1_i32 = arith.constant 1 : i32
    %182 = arith.cmpi eq, %arg1, %c1_i32 : i32
    %183 = arith.extui %182 : i1 to i32
    %c0_i32_66 = arith.constant 0 : i32
    %184 = arith.cmpi ne, %183, %c0_i32_66 : i32
    scf.if %184 {
      %185 = vector.shape_cast %180 : vector<16x32xf32> to vector<2x8x32xf32>
      %186 = vector.extract_strided_slice %185 {offsets = [0, 7, 0], sizes = [2, 1, 32], strides = [1, 1, 1]} : vector<2x8x32xf32> to vector<2x1x32xf32>
      %187 = vector.shape_cast %186 : vector<2x1x32xf32> to vector<2x32xf32>
      %c0_67 = arith.constant 0 : index
      %c0_68 = arith.constant 0 : index
      %c0_69 = arith.constant 0 : index
      %188 = vector.load %arg11[%c0_67, %c0_68, %c0_69] : memref<1x2x32xf32, #tpu.memory_space<vmem>>, vector<1x2x32xf32>
      %189 = vector.shape_cast %188 : vector<1x2x32xf32> to vector<2x32xf32>
      %190 = vector.shape_cast %187 : vector<2x32xf32> to vector<1x2x32xf32>
      tpu.vector_store %arg11[%c0_67, %c0_68, %c0_69], %190 {strides = array<i32>} : memref<1x2x32xf32, #tpu.memory_space<vmem>>, vector<1x2x32xf32>,
    } else {
    }
    return
  }
  func.func @transform_0(%arg0: i32, %arg1: i32) -> (i32, i32, i32) {
    %c0_i32 = arith.constant 0 : i32
    %c0_i32_0 = arith.constant 0 : i32
    %c0_i32_1 = arith.constant 0 : i32
    return %arg0, %c0_i32, %c0_i32_0 : i32, i32, i32
  }
  func.func @transform_1(%arg0: i32, %arg1: i32) -> (i32, i32) {
    %c0_i32 = arith.constant 0 : i32
    %c0_i32_0 = arith.constant 0 : i32
    %c0_i32_1 = arith.constant 0 : i32
    return %c0_i32, %c0_i32_0 : i32, i32
  }
  func.func @transform_2(%arg0: i32, %arg1: i32) -> (i32, i32, i32) {
    %c0_i32 = arith.constant 0 : i32
    %c0_i32_0 = arith.constant 0 : i32
    %c0_i32_1 = arith.constant 0 : i32
    return %arg1, %c0_i32, %c0_i32_0 : i32, i32, i32
  }
  func.func @transform_3(%arg0: i32, %arg1: i32) -> (i32, i32, i32) {
    %c0_i32 = arith.constant 0 : i32
    %c0_i32_0 = arith.constant 0 : i32
    %c0_i32_1 = arith.constant 0 : i32
    return %arg1, %c0_i32, %c0_i32_0 : i32, i32, i32
  }
  func.func @transform_4(%arg0: i32, %arg1: i32) -> (i32, i32, i32) {
    %c0_i32 = arith.constant 0 : i32
    %c0_i32_0 = arith.constant 0 : i32
    %c0_i32_1 = arith.constant 0 : i32
    return %arg1, %c0_i32, %c0_i32_0 : i32, i32, i32
  }
  func.func @transform_5(%arg0: i32, %arg1: i32) -> (i32, i32, i32) {
    %c0_i32 = arith.constant 0 : i32
    %c0_i32_0 = arith.constant 0 : i32
    %c0_i32_1 = arith.constant 0 : i32
    return %arg1, %c0_i32, %c0_i32_0 : i32, i32, i32
  }
  func.func @transform_6(%arg0: i32, %arg1: i32) -> (i32, i32, i32) {
    %c0_i32 = arith.constant 0 : i32
    %c0_i32_0 = arith.constant 0 : i32
    %c0_i32_1 = arith.constant 0 : i32
    return %arg1, %c0_i32, %c0_i32_0 : i32, i32, i32
  }
  func.func @transform_7(%arg0: i32, %arg1: i32) -> (i32, i32, i32) {
    %c0_i32 = arith.constant 0 : i32
    %c0_i32_0 = arith.constant 0 : i32
    %c0_i32_1 = arith.constant 0 : i32
    return %arg1, %c0_i32, %c0_i32_0 : i32, i32, i32
  }
  func.func @transform_8(%arg0: i32, %arg1: i32) -> (i32, i32, i32) {
    %c0_i32 = arith.constant 0 : i32
    %c0_i32_0 = arith.constant 0 : i32
    %c0_i32_1 = arith.constant 0 : i32
    return %arg1, %c0_i32, %c0_i32_0 : i32, i32, i32
  }
  func.func @transform_9(%arg0: i32, %arg1: i32) -> (i32, i32, i32) {
    %c0_i32 = arith.constant 0 : i32
    %c0_i32_0 = arith.constant 0 : i32
    %c0_i32_1 = arith.constant 0 : i32
    return %arg0, %c0_i32, %c0_i32_0 : i32, i32, i32
  }
}

</mosaic_0001>

<bundles_post_ra>
// kernel: tpu_custom_call.1
= control target key start
LH: loop header
LB: loop body
LE: loop exit
PB: predicated region body
PF: predicated region fallthrough
CT: control target
= control target key end

     0   :  { %s5349_s0 = inlined_call_operand.vmem [shape: f32[2,8,4], index: 0, kind: input, shape index: {}]   ;;  %s5350_s1 = inlined_call_operand.vmem [shape: bf16[4,32], index: 1, kind: input, shape index: {}]   ;;  %s5351_s2 = inlined_call_operand.vmem [shape: bf16[2,32,96], index: 2, kind: input, shape index: {}]   ;;  %s5352_s3 = inlined_call_operand.vmem [shape: bf16[2,32,32], index: 3, kind: input, shape index: {}]   ;;  %s5353_s4 = inlined_call_operand.vmem [shape: bf16[2,32,2048], index: 4, kind: input, shape index: {}]   ;;  %s5354_s5 = inlined_call_operand.vmem [shape: bf16[2,2048,32], index: 5, kind: input, shape index: {}]   ;;  %s5355_s6 = inlined_call_operand.vmem [shape: f32[2,1,96], index: 6, kind: input, shape index: {}]   ;;  %s5356_s7 = inlined_call_operand.vmem [shape: f32[2,1,2048], index: 7, kind: input, shape index: {}]   ;;  %s5357_s8 = inlined_call_operand.vmem [shape: f32[2,6,32], index: 8, kind: input, shape index: {}]   ;;  %s5358_s9 = inlined_call_operand.hbm [shape: f32[1,2,32], index: 9, kind: output, shape index: {}]  }
   0x1   :  { %5359 = sst [smem:[#allocation7_spill]] %s5351_s2 }
   0x2   :  { %5360 = sst [smem:[#allocation8_spill]] %s5352_s3 }
   0x3   :  { %14 = vsyncpa [#allocation4], 0  ;;  %s4788_s30 = smov 0   ;;  %s4790_s10 = smov 0  }
   0x4   :  { %s4792_s11 = smov 0  }
   0x5 LB: > { %s29_s13 = sadd.s32 1, %s4712_s10  ;;  %p3864_p1 = scmp.ge.s32.totalorder %s4716_s11, 1  ;;  %s4716_s11 = sphi %s4792_s11, %s20_s11   ;;  %s4712_s10 = sphi %s4790_s10, %s5368_s10   ;;  %s4708_s30 = sphi %s4788_s30, %s5367_s30  }
   0x6   : > { %p30_p0 = scmp.ge.s32.totalorder %s29_s13, 2  ;;  %p367_p2 = scmp.lt.s32.totalorder %s4716_s11, 3 }
   0x8   : > { %s5370_s13 = smov (%p30_p0, %s29_s13), 0  ;;  %p368_p3 = pnand %p3864_p1, %p367_p2 }
   0x9   : > { %5361 = sst [smem:[#allocation6_spill]] %s5370_s13  ;;  %p435_p4 = scmp.lt.s32.totalorder (!%p368_p3), %s4708_s30, 1 }
   0xa   : > { %371 = sbr.rel (%p368_p3) target bundleno = 4475 (0x117b), region = 56  ;;  %s5362_s2 = sld [smem:[#allocation7_spill]] (!%p368_p3) }
   0xb   : > { %s5363_s3 = sld [smem:[#allocation8_spill]] (!%p368_p3)  ;;  %p3875_p5 = scmp.ne.s32.totalorder (!%p368_p3), %s4708_s30, 0 }
  0x11   : > { %s4811_s14 = scalar_select %p435_p4, %s4708_s30, 1 }
  0x12   : > { %470 = sbr.rel (%p3875_p5) target bundleno = 238 (0xee), region = 60  ;;  %v474_v0 = vld [vmem:[%s5350_s1] sm:$0x3] (!%p3875_p5)  ;;  %vm479_vm0 = vcmask (!%p3875_p5), 1041408   ;;  %v4718_v2 = vmov (!%p3875_p5), 0.0   ;;  %vm4719_vm1 = vmmov (!%p3875_p5), 0  }
  0x13   : > { %s4083_s15 = sshll.u32 %s4811_s14, 4  ;;  %s4085_s16 = sshll.u32 %s4811_s14, 8  ;;  %v471_v1 = vld [vmem:[%s5349_s0] sm:$0xff] (!%p3875_p5)  ;;  %4307 = vmatprep.subr.bf16.mxu0 (!%p3875_p5), %v4718_v2  ;;  %v481_v3 = vsel (!%p3875_p5), %vm479_vm0, %v474_v0, 0  ;;  %4309 = vmatprep.mubr.msk.bf16.mxu0 (!%p3875_p5), %vm4719_vm1, %v4718_v2  ;;  %v472_v4 = vld [vmem:[%s5349_s0 + $0x8] sm:$0xff] (!%p3875_p5)  ;;  %vm475_vm2 = vcmask (!%p3875_p5), 31744  }
  0x14   : > { %s4818_s19 = scalar_lea.vmem %s5362_s2, %s4083_s15  ;;  %s4823_s22 = scalar_lea.vmem %s5363_s3, %s4083_s15  ;;  %4308 = vmatpush3.bf16.msra.mxu0 (!%p3875_p5), %v481_v3  ;;  %v473_v5 = vpack.c.bf16 (!%p3875_p5), %v472_v4, %v471_v1  ;;  %vm524_vm3 = vcmask (!%p3875_p5), 261120  }
  0x15   : > { %s4828_s25 = scalar_lea.vmem %s5353_s4, %s4085_s16  ;;  %s4086_s26 = sshll.u32 %s4811_s14, 10 }
  0x16   : > { %s4834_s29 = scalar_lea.vmem %s5354_s5, %s4086_s26  ;;  %s457_s18 = scalar_lea.vmem %s5355_s6, %s4811_s14 }
  0x17   : > { %s4843_s20 = scalar_lea.vmem %s5356_s7, %s4083_s15  ;;  %s3874_s21 = sshll.u32 %s4811_s14, 3  ;;  %4310 = vmatmul.mubr.msk.bf16.vlgmr.msra.gmra.mrb[0].mxu0 (!%p3875_p5), %vm475_vm2, %v473_v5 }
  0x18   : > { %s4849_s16 = scalar_lea.vmem %s5357_s8, %s3874_s21 }
  0xea   : > { %v517_v6 = vpop.f32.mrb[0].mxu0 }
  0xeb   : > { %525 = vst.msk [vmem:[#allocation2] sm:$0xff] %vm524_vm3, %v517_v6  ;;  %v4311_v7 = vpop.f32.mrb[1].mxu0 }
  0xec   : > { %v520_v8 = vpop.f32.mrb[2].mxu0 }
  0xed   : > { %526 = vst.msk [vmem:[#allocation2 + $0x8] sm:$0xff] %vm524_vm3, %v520_v8  ;;  %v4312_v9 = vpop.f32.mrb[3].mxu0 }
  0xee PF: > { %v4490_v10 = vld [vmem:[%s4818_s19] sm:$0xff]   ;;  %v4720_v11 = vmov 0.0   ;;  %v4491_v12 = vld [vmem:[%s4818_s19 + $0x8] sm:$0xff]   ;;  %vm4721_vm4 = vmmov 0   ;;  %vm553_vm5 = vcmask 261120   ;;  %s4722_s19 = smov 96  }
  0xef   : > { %4313 = vmatprep.subr.bf16.mxu0 %v4720_v11  ;;  %4321 = vmatprep.subr.bf16.mxu1 %v4720_v11  ;;  %v3877_v16 = vld [vmem:[%s457_s18] ss:$0 sm:$0xff]  ;;  %vm613_vm6 = vcmask 64512   ;;  %s4723_s14 = smov 64   ;;  %s4724_s28 = smov 88   ;;  %vm738_vm7 = vcmask 1043456  }
  0xf0   : > { %4314 = vmatpush3.bf16.msra.mxu0 %v4490_v10  ;;  %4317 = vmatprep.mubr.msk.bf16.mxu0 %vm4721_vm4, %v4720_v11  ;;  %s4725_s17 = smov 120   ;;  %s4726_s18 = smov 56   ;;  %vm1516_vm8 = vcmask 130048   ;;  %vm1519_vm9 = vcmask 195584  }
  0xf1   : > { %4315 = vmatprep.subr.bf16.mxu0 %v4720_v11  ;;  %4323 = vmatprep.mubr.msk.bf16.mxu1 %vm4721_vm4, %v4720_v11  ;;  %s4727_s21 = smov 80   ;;  %s4728_s23 = smov 112  }
  0xf2   : > { %v527_v13 = vld [vmem:[#allocation2] sm:$0xff]  ;;  %s4729_s24 = smov 48   ;;  %s4730_s26 = smov 72  }
  0xf3   : > { %s4731_s12 = smov 104   ;;  %s4732_s27 = smov 40  }
  0xf4   : > { %v528_v14 = vld [vmem:[#allocation2 + $0x8] sm:$0xff]  ;;  %4316 = vmatpush3.bf16.msra.mxu0 %v4491_v12  ;;  %s4733_s2 = smov 8   ;;  %s4734_s3 = smov 16  }
  0xf5   : > { %v529_v15 = vpack.c.bf16 %v528_v14, %v527_v13  ;;  %4327 = vmatprep.subr.bf16.mxu0 %v4720_v11  ;;  %s4735_s13 = smov 24   ;;  %p4078_p6 = scmp.ne.s32.totalorder %s4708_s30, 1 }
  0xf6   : > { %vm3713_vm10 = vcmask (!%p4078_p6), 261127   ;;  %vm3715_vm11 = vcmask (!%p4078_p6), 253952  }
  0xf7   : > { %4318 = vmatmul.mubr.msk.bf16.vlgmr.msra.gmra.mrb[0].mxu0 %vm553_vm5, %v529_v15 }
  0xf8   : > { %4329 = vmatprep.mubr.msk.bf16.mxu0 %vm4721_vm4, %v4720_v11 }
 0x1ca   : > { %v591_v17 = vpop.f32.mrb[0].mxu0 }
 0x1cb   : > { %v592_v18 = vadd.f32 %v3877_v16, %v591_v17  ;;  %v4319_v19 = vpop.f32.mrb[1].mxu0 }
 0x1cc   : > { %v594_v20 = vpop.f32.mrb[2].mxu0 }
 0x1cd   : > { %v4879_v21 = vpack.c.bf16 %v592_v18, %v592_v18  ;;  %v595_v22 = vadd.f32 %v3877_v16, %v594_v20  ;;  %v4320_v23 = vpop.f32.mrb[3].mxu0  ;;  %v598_v27 = vmul.f32 0.35355338, %v592_v18 }
 0x1cf   : > { %611 = vrot.lane.b32.xlu0 %v4879_v21, %s4722_s19  ;;  %v4882_v24 = vpack.c.bf16 %v595_v22, %v595_v22  ;;  %v4888_v30 = vpack.c.bf16 %v598_v27, %v598_v27  ;;  %v599_v31 = vmul.f32 0.35355338, %v595_v22 }
 0x1d1   : > { %v4895_v32 = vpack.c.bf16 %v599_v31, %v599_v31 }
 0x1d3   : > { %661 = vrot.lane.b32.xlu0 %v4882_v24, %s4722_s19 }
 0x241   : > { %v612_v25 = vpop.permute.xlu0 %611 }
 0x242   : > { %v618_v26 = vsel %vm613_vm6, %v612_v25, 0 }
 0x243   : > { %4322 = vmatpush3.bf16.xpose.msra.mxu1 %v618_v26 }
 0x244   : > { %4333 = vmatprep.subr.bf16.mxu1 %v4720_v11 }
 0x245   : > { %v662_v28 = vpop.permute.xlu0 %661 }
 0x246   : > { %v667_v29 = vsel %vm613_vm6, %v662_v28, 0 }
 0x247   : > { %4328 = vmatpush3.bf16.xpose.msra.mxu0 %v667_v29 }
 0x248   : > { %4339 = vmatprep.subr.bf16.mxu0 %v4720_v11 }
 0x24a   : > { %4324 = vmatmul.mubr.msk.bf16.vlgmr.msra.gmra.mrb[0].mxu1 %vm613_vm6, %v4888_v30 }
 0x24b   : > { %4335 = vmatprep.mubr.msk.bf16.mxu1 %vm4721_vm4, %v4720_v11 }
 0x24e   : > { %4330 = vmatmul.mubr.msk.bf16.vlgmr.msra.gmra.mrb[4].mxu0 %vm613_vm6, %v4895_v32 }
 0x24f   : > { %4341 = vmatprep.mubr.msk.bf16.mxu0 %vm4721_vm4, %v4720_v11 }
 0x31d   : > { %v654_v33 = vpop.f32.mrb[0].mxu1 }
 0x31e   : > { %v4325_v34 = vpop.f32.mrb[1].mxu1  ;;  %v709_v35 = vsel %vm613_vm6, %v654_v33, -inf }
 0x31f   : > { %710 = vmax.xlane.f32.xlu1 %v709_v35  ;;  %v657_v36 = vpop.f32.mrb[2].mxu1 }
 0x320   : > { %v4326_v37 = vpop.f32.mrb[3].mxu1 }
 0x321   : > { %v703_v38 = vpop.f32.mrb[4].mxu0 }
 0x322   : > { %v4331_v39 = vpop.f32.mrb[5].mxu0  ;;  %v712_v40 = vsel %vm613_vm6, %v703_v38, -inf }
 0x323   : > { %713 = vmax.xlane.f32.xlu1 %v712_v40  ;;  %v706_v41 = vpop.f32.mrb[6].mxu0 }
 0x324   : > { %v4332_v42 = vpop.f32.mrb[7].mxu0 }
 0x334   : > { %733 = vrot.lane.b32.xlu1 %v4879_v21, %s4723_s14 }
 0x338   : > { %782 = vrot.lane.b32.xlu1 %v4882_v24, %s4723_s14 }
 0x33c   : > { %832 = vrot.lane.b32.xlu1 %v4879_v21, %s4724_s28 }
 0x3ac   : > { %v711_v43 = vpop.xlane.xlu1 %710 }
 0x3ad   : > { %v715_v44 = vsub.f32 %v654_v33, %v711_v43 }
 0x3af   : > { %v717_v45 = vmul.f32 1.442695, %v715_v44 }
 0x3b0   : > { %v714_v46 = vpop.xlane.xlu1 %713 }
 0x3b1   : > { %4622 = vpow2.f32 %v717_v45  ;;  %v716_v47 = vsub.f32 %v703_v38, %v714_v46 }
 0x3b3   : > { %v719_v48 = vmul.f32 1.442695, %v716_v47 }
 0x3b4   : > { %v734_v49 = vpop.permute.xlu1 %733 }
 0x3b5   : > { %4624 = vpow2.f32 %v719_v48  ;;  %v740_v50 = vsel %vm738_vm7, %v734_v49, 0 }
 0x3b6   : > { %4334 = vmatpush3.bf16.msra.mxu1 %v740_v50 }
 0x3b7   : > { %4345 = vmatprep.subr.bf16.mxu1 %v4720_v11 }
 0x3b8   : > { %v783_v51 = vpop.permute.xlu1 %782 }
 0x3b9   : > { %v788_v52 = vsel %vm738_vm7, %v783_v51, 0 }
 0x3ba   : > { %4340 = vmatpush3.bf16.msra.mxu0 %v788_v52 }
 0x3bb   : > { %v4623_v53 = vpop.eup %4622  ;;  %4351 = vmatprep.subr.bf16.mxu0 %v4720_v11 }
 0x3bc   : > { %v721_v54 = vsel %vm613_vm6, %v4623_v53, 0.0  ;;  %v833_v57 = vpop.permute.xlu1 %832 }
 0x3bd   : > { %722 = vadd.xlane.f32.xlu0 %v721_v54  ;;  %v838_v0 = vsel %vm613_vm6, %v833_v57, 0 }
 0x3bf   : > { %v4625_v55 = vpop.eup %4624 }
 0x3c0   : > { %v724_v56 = vsel %vm613_vm6, %v4625_v55, 0.0 }
 0x3c1   : > { %725 = vadd.xlane.f32.xlu1 %v724_v56 }
 0x3d2   : > { %882 = vrot.lane.b32.xlu1 %v4882_v24, %s4724_s28 }
 0x3d3   : > { %830 = vrot.lane.b32.xlu0 %v4888_v30, %s4725_s17 }
 0x3d6   : > { %880 = vrot.lane.b32.xlu1 %v4895_v32, %s4725_s17 }
 0x44a   : > { %v723_v58 = vpop.xlane.xlu0 %722 }
 0x44b   : > { %4626 = vrcp.f32 %v723_v58 }
 0x44e   : > { %v726_v59 = vpop.xlane.xlu1 %725  ;;  %v831_v5 = vpop.permute.xlu0 %830 }
 0x44f   : > { %4628 = vrcp.f32 %v726_v59 }
 0x452   : > { %v883_v2 = vpop.permute.xlu1 %882 }
 0x453   : > { %v888_v4 = vsel %vm613_vm6, %v883_v2, 0 }
 0x455   : > { %v4627_v60 = vpop.eup %4626 }
 0x456   : > { %v729_v61 = vmul.f32 %v4627_v60, %v4623_v53  ;;  %v881_v6 = vpop.permute.xlu1 %880 }
 0x458   : > { %v731_v62 = vpack.c.bf16 %v729_v61, %v729_v61 }
 0x459   : > { %v4629_v63 = vpop.eup %4628 }
 0x45a   : > { %v730_v1 = vmul.f32 %v4629_v63, %v4625_v55  ;;  %4336 = vmatmul.mubr.msk.bf16.vlgmr.msra.gmra.mrb[4].mxu1 %vm613_vm6, %v731_v62 }
 0x45b   : > { %4346 = vmatpush3.bf16.xpose.msra.mxu1 %v838_v0  ;;  %4347 = vmatprep.mubr.msk.bf16.mxu1 %vm4721_vm4, %v4720_v11 }
 0x45c   : > { %v732_v3 = vpack.c.bf16 %v730_v1, %v730_v1  ;;  %4357 = vmatprep.subr.bf16.mxu1 %v4720_v11 }
 0x45e   : > { %4342 = vmatmul.mubr.msk.bf16.vlgmr.msra.gmra.mrb[8].mxu0 %vm613_vm6, %v732_v3 }
 0x45f   : > { %4352 = vmatpush3.bf16.xpose.msra.mxu0 %v888_v4  ;;  %4353 = vmatprep.mubr.msk.bf16.mxu0 %vm4721_vm4, %v4720_v11 }
 0x460   : > { %4363 = vmatprep.subr.bf16.mxu0 %v4720_v11 }
 0x462   : > { %4348 = vmatmul.mubr.msk.bf16.vlgmr.msra.gmra.mrb[8].mxu1 %vm613_vm6, %v831_v5 }
 0x463   : > { %4359 = vmatprep.mubr.msk.bf16.mxu1 %vm4721_vm4, %v4720_v11 }
 0x466   : > { %4354 = vmatmul.mubr.msk.bf16.vlgmr.msra.gmra.mrb[12].mxu0 %vm613_vm6, %v881_v6 }
 0x467   : > { %4365 = vmatprep.mubr.msk.bf16.mxu0 %vm4721_vm4, %v4720_v11 }
 0x52d   : > { %v4931_v7 = vpop.f32.mrb[4].mxu1 }
 0x52e   : > { %v4337_v8 = vpop.f32.mrb[5].mxu1 }
 0x52f   : > { %v779_v9 = vpop.f32.mrb[6].mxu1 }
 0x530   : > { %v4338_v10 = vpop.f32.mrb[7].mxu1 }
 0x531   : > { %v4933_v12 = vpop.f32.mrb[8].mxu0 }
 0x532   : > { %v4343_v13 = vpop.f32.mrb[9].mxu0 }
 0x533   : > { %v827_v14 = vpop.f32.mrb[10].mxu0 }
 0x534   : > { %v4344_v15 = vpop.f32.mrb[11].mxu0 }
 0x535   : > { %v874_v16 = vpop.f32.mrb[8].mxu1 }
 0x536   : > { %v4349_v17 = vpop.f32.mrb[9].mxu1  ;;  %v930_v18 = vsel %vm613_vm6, %v874_v16, -inf }
 0x537   : > { %931 = vmax.xlane.f32.xlu1 %v930_v18  ;;  %v877_v19 = vpop.f32.mrb[10].mxu1 }
 0x538   : > { %v4350_v20 = vpop.f32.mrb[11].mxu1 }
 0x539   : > { %v924_v22 = vpop.f32.mrb[12].mxu0 }
 0x53a   : > { %v4355_v23 = vpop.f32.mrb[13].mxu0  ;;  %v933_v25 = vsel %vm613_vm6, %v924_v22, -inf }
 0x53b   : > { %934 = vmax.xlane.f32.xlu0 %v933_v25  ;;  %v927_v26 = vpop.f32.mrb[14].mxu0 }
 0x53c   : > { %v4356_v27 = vpop.f32.mrb[15].mxu0 }
 0x548   : > { %954 = vrot.lane.b32.xlu1 %v4879_v21, %s4726_s18 }
 0x54c   : > { %1052 = vrot.lane.b32.xlu1 %v4879_v21, %s4727_s21 }
 0x551   : > { %1002 = vrot.lane.b32.xlu0 %v4882_v24, %s4726_s18 }
 0x555   : > { %1050 = vrot.lane.b32.xlu0 %v4888_v30, %s4728_s23 }
 0x5c4   : > { %v932_v28 = vpop.xlane.xlu1 %931 }
 0x5c5   : > { %v936_v29 = vsub.f32 %v874_v16, %v932_v28 }
 0x5c7   : > { %v938_v31 = vmul.f32 1.442695, %v936_v29 }
 0x5c8   : > { %v955_v33 = vpop.permute.xlu1 %954  ;;  %v935_v34 = vpop.xlane.xlu0 %934 }
 0x5c9   : > { %4630 = vpow2.f32 %v938_v31  ;;  %v960_v35 = vsel %vm738_vm7, %v955_v33, 0  ;;  %v937_v36 = vsub.f32 %v924_v22, %v935_v34 }
 0x5ca   : > { %4358 = vmatpush3.bf16.msra.mxu1 %v960_v35 }
 0x5cb   : > { %v940_v37 = vmul.f32 1.442695, %v937_v36  ;;  %4369 = vmatprep.subr.bf16.mxu1 %v4720_v11 }
 0x5cc   : > { %v1003_v38 = vpop.permute.xlu0 %1002  ;;  %v1053_v44 = vpop.permute.xlu1 %1052 }
 0x5cd   : > { %4632 = vpow2.f32 %v940_v37  ;;  %v1008_v39 = vsel %vm738_vm7, %v1003_v38, 0  ;;  %v1058_v51 = vsel %vm613_vm6, %v1053_v44, 0 }
 0x5ce   : > { %4364 = vmatpush3.bf16.msra.mxu0 %v1008_v39 }
 0x5cf   : > { %4375 = vmatprep.subr.bf16.mxu0 %v4720_v11 }
 0x5d0   : > { %v1051_v56 = vpop.permute.xlu0 %1050 }
 0x5d3   : > { %v4631_v40 = vpop.eup %4630 }
 0x5d4   : > { %v942_v41 = vsel %vm613_vm6, %v4631_v40, 0.0 }
 0x5d5   : > { %943 = vadd.xlane.f32.xlu1 %v942_v41 }
 0x5d7   : > { %v4633_v42 = vpop.eup %4632 }
 0x5d8   : > { %v945_v43 = vsel %vm613_vm6, %v4633_v42, 0.0 }
 0x5d9   : > { %946 = vadd.xlane.f32.xlu1 %v945_v43 }
 0x5ea   : > { %1102 = vrot.lane.b32.xlu1 %v4882_v24, %s4727_s21 }
 0x5ee   : > { %1100 = vrot.lane.b32.xlu1 %v4895_v32, %s4728_s23 }
 0x662   : > { %v944_v45 = vpop.xlane.xlu1 %943 }
 0x663   : > { %4634 = vrcp.f32 %v944_v45 }
 0x666   : > { %v947_v46 = vpop.xlane.xlu1 %946 }
 0x667   : > { %4636 = vrcp.f32 %v947_v46 }
 0x66a   : > { %v1103_v53 = vpop.permute.xlu1 %1102 }
 0x66b   : > { %v1108_v55 = vsel %vm613_vm6, %v1103_v53, 0 }
 0x66d   : > { %v4635_v47 = vpop.eup %4634 }
 0x66e   : > { %v950_v48 = vmul.f32 %v4635_v47, %v4631_v40  ;;  %v1101_v57 = vpop.permute.xlu1 %1100 }
 0x670   : > { %v952_v49 = vpack.c.bf16 %v950_v48, %v950_v48 }
 0x671   : > { %v4637_v50 = vpop.eup %4636 }
 0x672   : > { %v951_v52 = vmul.f32 %v4637_v50, %v4633_v42  ;;  %4360 = vmatmul.mubr.msk.bf16.vlgmr.msra.gmra.mrb[12].mxu1 %vm613_vm6, %v952_v49 }
 0x673   : > { %4370 = vmatpush3.bf16.xpose.msra.mxu1 %v1058_v51  ;;  %4371 = vmatprep.mubr.msk.bf16.mxu1 %vm4721_vm4, %v4720_v11 }
 0x674   : > { %v953_v54 = vpack.c.bf16 %v951_v52, %v951_v52  ;;  %4381 = vmatprep.subr.bf16.mxu1 %v4720_v11 }
 0x676   : > { %4366 = vmatmul.mubr.msk.bf16.vlgmr.msra.gmra.mrb[16].mxu0 %vm613_vm6, %v953_v54 }
 0x677   : > { %4376 = vmatpush3.bf16.xpose.msra.mxu0 %v1108_v55  ;;  %4377 = vmatprep.mubr.msk.bf16.mxu0 %vm4721_vm4, %v4720_v11 }
 0x678   : > { %4387 = vmatprep.subr.bf16.mxu0 %v4720_v11 }
 0x67a   : > { %4372 = vmatmul.mubr.msk.bf16.vlgmr.msra.gmra.mrb[16].mxu1 %vm613_vm6, %v1051_v56 }
 0x67b   : > { %4383 = vmatprep.mubr.msk.bf16.mxu1 %vm4721_vm4, %v4720_v11 }
 0x67e   : > { %4378 = vmatmul.mubr.msk.bf16.vlgmr.msra.gmra.mrb[20].mxu0 %vm613_vm6, %v1101_v57 }
 0x67f   : > { %4389 = vmatprep.mubr.msk.bf16.mxu0 %vm4721_vm4, %v4720_v11 }
 0x745   : > { %v4965_v58 = vpop.f32.mrb[12].mxu1 }
 0x746   : > { %v4361_v59 = vpop.f32.mrb[13].mxu1 }
 0x747   : > { %v999_v60 = vpop.f32.mrb[14].mxu1 }
 0x748   : > { %v4362_v61 = vpop.f32.mrb[15].mxu1 }
 0x749   : > { %v4967_v62 = vpop.f32.mrb[16].mxu0 }
 0x74a   : > { %v4475_v63 = vpack.i.bf16 %v4967_v62, %v4965_v58  ;;  %v4367_v0 = vpop.f32.mrb[17].mxu0 }
 0x74b   : > { %v1047_v1 = vpop.f32.mrb[18].mxu0 }
 0x74c   : > { %v4368_v2 = vpop.f32.mrb[19].mxu0 }
 0x74d   : > { %v1094_v3 = vpop.f32.mrb[16].mxu1 }
 0x74e   : > { %v4373_v4 = vpop.f32.mrb[17].mxu1  ;;  %v1150_v5 = vsel %vm613_vm6, %v1094_v3, -inf }
 0x74f   : > { %1151 = vmax.xlane.f32.xlu0 %v1150_v5  ;;  %v1097_v6 = vpop.f32.mrb[18].mxu1 }
 0x750   : > { %v4374_v8 = vpop.f32.mrb[19].mxu1 }
 0x751   : > { %v1144_v9 = vpop.f32.mrb[20].mxu0 }
 0x752   : > { %v4379_v10 = vpop.f32.mrb[21].mxu0  ;;  %v1153_v13 = vsel %vm613_vm6, %v1144_v9, -inf }
 0x753   : > { %1154 = vmax.xlane.f32.xlu1 %v1153_v13  ;;  %v1147_v14 = vpop.f32.mrb[22].mxu0 }
 0x754   : > { %v4380_v15 = vpop.f32.mrb[23].mxu0 }
 0x764   : > { %1174 = vrot.lane.b32.xlu1 %v4879_v21, %s4729_s24 }
 0x768   : > { %1272 = vrot.lane.b32.xlu1 %v4879_v21, %s4730_s26 }
 0x76c   : > { %1322 = vrot.lane.b32.xlu1 %v4882_v24, %s4730_s26 }
 0x770   : > { %1320 = vrot.lane.b32.xlu1 %v4895_v32, %s4731_s12 }
 0x7dc   : > { %v1152_v16 = vpop.xlane.xlu0 %1151 }
 0x7dd   : > { %v1156_v17 = vsub.f32 %v1094_v3, %v1152_v16 }
 0x7df   : > { %v1158_v18 = vmul.f32 1.442695, %v1156_v17 }
 0x7e0   : > { %v1155_v19 = vpop.xlane.xlu1 %1154 }
 0x7e1   : > { %4638 = vpow2.f32 %v1158_v18  ;;  %v1157_v20 = vsub.f32 %v1144_v9, %v1155_v19 }
 0x7e3   : > { %v1160_v22 = vmul.f32 1.442695, %v1157_v20 }
 0x7e4   : > { %v1175_v23 = vpop.permute.xlu1 %1174 }
 0x7e5   : > { %4640 = vpow2.f32 %v1160_v22  ;;  %v1180_v25 = vsel %vm738_vm7, %v1175_v23, 0 }
 0x7e6   : > { %4382 = vmatpush3.bf16.msra.mxu1 %v1180_v25 }
 0x7e7   : > { %4393 = vmatprep.subr.bf16.mxu1 %v4720_v11 }
 0x7e8   : > { %v1273_v36 = vpop.permute.xlu1 %1272 }
 0x7e9   : > { %v1278_v40 = vsel %vm613_vm6, %v1273_v36, 0 }
 0x7eb   : > { %v4639_v26 = vpop.eup %4638 }
 0x7ec   : > { %v1162_v27 = vsel %vm613_vm6, %v4639_v26, 0.0 }
 0x7ed   : > { %1163 = vadd.xlane.f32.xlu0 %v1162_v27  ;;  %v4493_v27 = vld [vmem:[%s4823_s22 + $0x8] sm:$0xff]  }
 0x7ef   : > { %v4641_v28 = vpop.eup %4640 }
 0x7f0   : > { %v1165_v32 = vsel %vm613_vm6, %v4641_v28, 0.0 }
 0x7f1   : > { %1166 = vadd.xlane.f32.xlu0 %v1165_v32 }
 0x807   : > { %1222 = vrot.lane.b32.xlu0 %v4882_v24, %s4729_s24 }
 0x80b   : > { %1270 = vrot.lane.b32.xlu0 %v4888_v30, %s4731_s12  ;;  %v1323_v30 = vpop.permute.xlu1 %1322 }
 0x80c   : > { %v1328_v43 = vsel %vm613_vm6, %v1323_v30, 0 }
 0x80f   : > { %v1321_v45 = vpop.permute.xlu1 %1320 }
 0x87a   : > { %v1164_v29 = vpop.xlane.xlu0 %1163 }
 0x87b   : > { %4642 = vrcp.f32 %v1164_v29 }
 0x87e   : > { %v1167_v31 = vpop.xlane.xlu0 %1166 }
 0x87f   : > { %4644 = vrcp.f32 %v1167_v31 }
 0x882   : > { %v1223_v33 = vpop.permute.xlu0 %1222 }
 0x883   : > { %v1228_v34 = vsel %vm738_vm7, %v1223_v33, 0 }
 0x884   : > { %4388 = vmatpush3.bf16.msra.mxu0 %v1228_v34 }
 0x885   : > { %v4643_v35 = vpop.eup %4642  ;;  %4399 = vmatprep.subr.bf16.mxu0 %v4720_v11 }
 0x886   : > { %v1170_v37 = vmul.f32 %v4643_v35, %v4639_v26  ;;  %v1271_v44 = vpop.permute.xlu0 %1270  ;;  %v4492_v26 = vld [vmem:[%s4823_s22] sm:$0xff]  }
 0x888   : > { %v1172_v38 = vpack.c.bf16 %v1170_v37, %v1170_v37 }
 0x889   : > { %v4645_v39 = vpop.eup %4644 }
 0x88a   : > { %v1171_v41 = vmul.f32 %v4645_v39, %v4641_v28  ;;  %4384 = vmatmul.mubr.msk.bf16.vlgmr.msra.gmra.mrb[20].mxu1 %vm613_vm6, %v1172_v38 }
 0x88b   : > { %4394 = vmatpush3.bf16.xpose.msra.mxu1 %v1278_v40  ;;  %4395 = vmatprep.mubr.msk.bf16.mxu1 %vm4721_vm4, %v4720_v11 }
 0x88c   : > { %v1173_v42 = vpack.c.bf16 %v1171_v41, %v1171_v41  ;;  %4405 = vmatprep.subr.bf16.mxu1 %v4720_v11 }
 0x88e   : > { %4390 = vmatmul.mubr.msk.bf16.vlgmr.msra.gmra.mrb[24].mxu0 %vm613_vm6, %v1173_v42 }
 0x88f   : > { %4400 = vmatpush3.bf16.xpose.msra.mxu0 %v1328_v43  ;;  %4401 = vmatprep.mubr.msk.bf16.mxu0 %vm4721_vm4, %v4720_v11 }
 0x890   : > { %4411 = vmatprep.subr.bf16.mxu0 %v4720_v11 }
 0x892   : > { %4396 = vmatmul.mubr.msk.bf16.vlgmr.msra.gmra.mrb[24].mxu1 %vm613_vm6, %v1271_v44 }
 0x893   : > { %4407 = vmatprep.mubr.msk.bf16.mxu1 %vm4721_vm4, %v4720_v11 }
 0x896   : > { %4402 = vmatmul.mubr.msk.bf16.vlgmr.msra.gmra.mrb[28].mxu0 %vm613_vm6, %v1321_v45 }
 0x897   : > { %4413 = vmatprep.mubr.msk.bf16.mxu0 %vm4721_vm4, %v4720_v11 }
 0x95d   : > { %v1216_v46 = vpop.f32.mrb[20].mxu1 }
 0x95e   : > { %v4385_v47 = vpop.f32.mrb[21].mxu1 }
 0x95f   : > { %v1219_v48 = vpop.f32.mrb[22].mxu1 }
 0x960   : > { %v4386_v49 = vpop.f32.mrb[23].mxu1 }
 0x961   : > { %v1264_v50 = vpop.f32.mrb[24].mxu0 }
 0x962   : > { %v4480_v51 = vpack.i.bf16 %v1264_v50, %v1216_v46  ;;  %v4391_v52 = vpop.f32.mrb[25].mxu0 }
 0x963   : > { %v1267_v53 = vpop.f32.mrb[26].mxu0  ;;  %v3901_v52 = vld [vmem:[%s4849_s16] ss:$0 sm:$0xff] }
 0x964   : > { %v4392_v54 = vpop.f32.mrb[27].mxu0 }
 0x965   : > { %v1314_v55 = vpop.f32.mrb[24].mxu1 }
 0x966   : > { %v4397_v56 = vpop.f32.mrb[25].mxu1  ;;  %v1370_v57 = vsel %vm613_vm6, %v1314_v55, -inf }
 0x967   : > { %1371 = vmax.xlane.f32.xlu0 %v1370_v57  ;;  %v1317_v59 = vpop.f32.mrb[26].mxu1 }
 0x968   : > { %v4398_v60 = vpop.f32.mrb[27].mxu1 }
 0x969   : > { %v1364_v61 = vpop.f32.mrb[28].mxu0 }
 0x96a   : > { %v4403_v0 = vpop.f32.mrb[29].mxu0  ;;  %v1373_v1 = vsel %vm613_vm6, %v1364_v61, -inf }
 0x96b   : > { %1374 = vmax.xlane.f32.xlu1 %v1373_v1  ;;  %v1367_v2 = vpop.f32.mrb[30].mxu0 }
 0x96c   : > { %v4404_v3 = vpop.f32.mrb[31].mxu0 }
 0x97c   : > { %1394 = vrot.lane.b32.xlu1 %v4879_v21, %s4732_s27 }
 0x980   : > { %4476 = vrot.lane.b32.xlu1 %v4475_v63, %s4733_s2 }
 0x984   : > { %4481 = vrot.lane.b32.xlu1 %v4480_v51, %s4734_s3 }
 0x9f4   : > { %v1372_v4 = vpop.xlane.xlu0 %1371 }
 0x9f5   : > { %v1376_v5 = vsub.f32 %v1314_v55, %v1372_v4 }
 0x9f7   : > { %v1378_v6 = vmul.f32 1.442695, %v1376_v5 }
 0x9f8   : > { %v1375_v8 = vpop.xlane.xlu1 %1374 }
 0x9f9   : > { %4646 = vpow2.f32 %v1378_v6  ;;  %v1377_v9 = vsub.f32 %v1364_v61, %v1375_v8  ;;  %v4663_v61 = vld [vmem:[#allocation2 + $0x8] sm:$0xff] }
 0x9fb   : > { %v1380_v10 = vmul.f32 1.442695, %v1377_v9 }
 0x9fc   : > { %v1395_v13 = vpop.permute.xlu1 %1394 }
 0x9fd   : > { %4648 = vpow2.f32 %v1380_v10  ;;  %v1400_v14 = vsel %vm738_vm7, %v1395_v13, 0 }
 0x9fe   : > { %4406 = vmatpush3.bf16.msra.mxu1 %v1400_v14 }
 0x9ff   : > { %4417 = vmatprep.subr.bf16.mxu1 %v4720_v11 }
 0xa00   : > { %v4477_v38 = vpop.permute.xlu1 %4476 }
 0xa01   : > { %v4479_v40 = vunpack.i.h.bf16 %v4477_v38  ;;  %v4478_v41 = vunpack.i.l.bf16 %v4477_v38 }
 0xa03   : > { %v4647_v21 = vpop.eup %4646  ;;  %v1515_v43 = vsel %vm613_vm6, %v4933_v12, %v4479_v40  ;;  %v1514_v44 = vsel %vm613_vm6, %v4931_v7, %v4478_v41  ;;  %v4662_v12 = vld [vmem:[#allocation2] sm:$0xff] }
 0xa04   : > { %v1382_v58 = vsel %vm613_vm6, %v4647_v21, 0.0  ;;  %v4482_v39 = vpop.permute.xlu1 %4481 }
 0xa05   : > { %1383 = vadd.xlane.f32.xlu0 %v1382_v58  ;;  %v4484_v30 = vunpack.i.h.bf16 %v4482_v39  ;;  %v1640_v58 = vld [vmem:[%s4828_s25 + $0x40] sm:$0xff] }
 0xa07   : > { %v4649_v62 = vpop.eup %4648  ;;  %v1518_v48 = vsel %vm1516_vm8, %v1515_v43, %v4484_v30  ;;  %v3905_v43 = vld [vmem:[%s4849_s16 + $0x2] ss:$0 sm:$0xff] }
 0xa08   : > { %v1385_v63 = vsel %vm613_vm6, %v4649_v62, 0.0 }
 0xa09   : > { %1386 = vadd.xlane.f32.xlu0 %v1385_v63 }
 0xa1f   : > { %1442 = vrot.lane.b32.xlu0 %v4882_v24, %s4732_s27 }
 0xa92   : > { %v1384_v15 = vpop.xlane.xlu0 %1383 }
 0xa93   : > { %4650 = vrcp.f32 %v1384_v15  ;;  %v1641_v15 = vld [vmem:[%s4828_s25 + $0x48] sm:$0xff] }
 0xa96   : > { %v1387_v16 = vpop.xlane.xlu0 %1386 }
 0xa97   : > { %4652 = vrcp.f32 %v1387_v16 }
 0xa9a   : > { %v1443_v17 = vpop.permute.xlu0 %1442 }
 0xa9b   : > { %v1448_v18 = vsel %vm738_vm7, %v1443_v17, 0 }
 0xa9c   : > { %4412 = vmatpush3.bf16.msra.mxu0 %v1448_v18 }
 0xa9d   : > { %v4651_v19 = vpop.eup %4650 }
 0xa9e   : > { %v1390_v20 = vmul.f32 %v4651_v19, %v4647_v21  ;;  %v1632_v21 = vld [vmem:[%s4828_s25] sm:$0xff] }
 0xa9f   : > { %v3908_v63 = vcombine.high %v1632_v21, %v1640_v58  ;;  %v3907_v16 = vcombine.low %v1632_v21, %v1640_v58  ;;  %v1648_v19 = vld [vmem:[%s4828_s25 + $0x80] sm:$0xff]  ;;  %v1638_v21 = vld [vmem:[%s4828_s25 + $0x30] sm:$0xff] }
 0xaa0   : > { %v1392_v22 = vpack.c.bf16 %v1390_v20, %v1390_v20  ;;  %v1656_v20 = vld [vmem:[%s4828_s25 + $0xc0] sm:$0xff]  ;;  %v1646_v58 = vld [vmem:[%s4828_s25 + $0x70] sm:$0xff] }
 0xaa1   : > { %v4653_v23 = vpop.eup %4652  ;;  %1911 = vmatprep.subr.bf16.mxu0 %v3908_v63  ;;  %v1647_v63 = vld [vmem:[%s4828_s25 + $0x78] sm:$0xff] }
 0xaa2   : > { %v1391_v25 = vmul.f32 %v4653_v23, %v4649_v62  ;;  %4408 = vmatmul.mubr.msk.bf16.vlgmr.msra.gmra.mrb[28].mxu1 %vm613_vm6, %v1392_v22  ;;  %v1633_v62 = vld [vmem:[%s4828_s25 + $0x8] sm:$0xff]  ;;  %v3924_v23 = vcombine.high %v1648_v19, %v1656_v20 }
 0xaa3   : > { %4421 = vmatprep.mubr.msk.bf16.mxu1 %vm4721_vm4, %v4720_v11  ;;  %4418 = vmatpush3.bf16.msra.mxu1 %v4492_v26  ;;  %v3909_v17 = vcombine.low %v1633_v62, %v1641_v15  ;;  %v3910_v18 = vcombine.high %v1633_v62, %v1641_v15  ;;  %v1649_v22 = vld [vmem:[%s4828_s25 + $0x88] sm:$0xff]  ;;  %v1639_v62 = vld [vmem:[%s4828_s25 + $0x38] sm:$0xff] }
 0xaa4   : > { %v1393_v24 = vpack.c.bf16 %v1391_v25, %v1391_v25  ;;  %4419 = vmatprep.subr.bf16.mxu1 %v4720_v11  ;;  %v4483_v11 = vunpack.i.l.bf16 %v4482_v39  ;;  %v1657_v25 = vld [vmem:[%s4828_s25 + $0xc8] sm:$0xff] }
 0xaa5   : > { %v3925_v26 = vcombine.low %v1649_v22, %v1657_v25 }
 0xaa6   : > { %4414 = vmatmul.mubr.msk.bf16.vlgmr.msra.gmra.mrb[32].mxu0 %vm613_vm6, %v1393_v24  ;;  %v1517_v47 = vsel %vm1516_vm8, %v1514_v44, %v4483_v11  ;;  %v3923_v24 = vcombine.low %v1648_v19, %v1656_v20  ;;  %v1654_v19 = vld [vmem:[%s4828_s25 + $0xb0] sm:$0xff] }
 0xaa7   : > { %4420 = vmatpush3.bf16.msra.mxu1 %v4493_v27  ;;  %1912 = vmatpush1.bf16.msra.mxu0 %v3907_v16  ;;  %v3926_v27 = vcombine.high %v1649_v22, %v1657_v25  ;;  %v1662_v20 = vld [vmem:[%s4828_s25 + $0xf0] sm:$0xff]  ;;  %v1655_v22 = vld [vmem:[%s4828_s25 + $0xb8] sm:$0xff]  ;;  %v3919_v25 = vcombine.low %v1638_v21, %v1646_v58 }
 0xaa8   : > { %1954 = vmatprep.subr.bf16.mxu1 %v3910_v18  ;;  %1913 = vmatprep.subr.bf16.mxu0 %v3924_v23  ;;  %v3922_v18 = vcombine.high %v1639_v62, %v1647_v63  ;;  %v1663_v23 = vld [vmem:[%s4828_s25 + $0xf8] sm:$0xff] }
 0xaab   : > { %1914 = vmatpush1.bf16.msra.mxu0 %v3923_v24  ;;  %v3921_v24 = vcombine.low %v1639_v62, %v1647_v63 }
 0xb75   : > { %v1436_v28 = vpop.f32.mrb[28].mxu1 }
 0xb76   : > { %v4409_v32 = vpop.f32.mrb[29].mxu1 }
 0xb77   : > { %v1439_v29 = vpop.f32.mrb[30].mxu1  ;;  %v1642_v32 = vld [vmem:[%s4828_s25 + $0x50] sm:$0xff] }
 0xb78   : > { %v4410_v31 = vpop.f32.mrb[31].mxu1  ;;  %v1635_v29 = vld [vmem:[%s4828_s25 + $0x18] sm:$0xff] }
 0xb79   : > { %v1484_v33 = vpop.f32.mrb[32].mxu0  ;;  %v4736_v31 = vmov 0  }
 0xb7a   : > { %v4485_v34 = vpack.i.bf16 %v1484_v33, %v1436_v28  ;;  %v4415_v35 = vpop.f32.mrb[33].mxu0  ;;  %v1634_v28 = vld [vmem:[%s4828_s25 + $0x10] sm:$0xff]  ;;  %1943 = vmatprep.mubr.bf16.mxu0 %v4736_v31 }
 0xb7b   : > { %v1487_v36 = vpop.f32.mrb[34].mxu0  ;;  %v3912_v33 = vcombine.high %v1634_v28, %v1642_v32  ;;  %v3911_v35 = vcombine.low %v1634_v28, %v1642_v32  ;;  %v3935_v28 = vcombine.low %v1654_v19, %v1662_v20  ;;  %v3937_v32 = vcombine.low %v1655_v22, %v1663_v23 }
 0xb7c   : > { %4486 = vrot.lane.b32.xlu0 %v4485_v34, %s4735_s13  ;;  %v4416_v37 = vpop.f32.mrb[35].mxu0  ;;  %v1643_v34 = vld [vmem:[%s4828_s25 + $0x58] sm:$0xff] }
 0xb7d   : > { %v3913_v36 = vcombine.low %v1635_v29, %v1643_v34  ;;  %v3914_v37 = vcombine.high %v1635_v29, %v1643_v34  ;;  %1997 = vmatprep.subr.bf16.mxu0 %v3912_v33  ;;  %v4494_v29 = vld [vmem:[%s4834_s29 + $0x40] sm:$0xff]  }
 0xb7e   : > { %v4495_v33 = vld [vmem:[%s4834_s29 + $0xc0] sm:$0xff]  }
 0xb7f   : > { %v4496_v34 = vld [vmem:[%s4834_s29] sm:$0xff]  }
 0xbee   : > { %v4487_v42 = vpop.permute.xlu0 %4486 }
 0xbef   : > { %v4489_v45 = vunpack.i.h.bf16 %v4487_v42  ;;  %v4488_v46 = vunpack.i.l.bf16 %v4487_v42 }
 0xbf1   : > { %v1521_v49 = vsel %vm1519_vm9, %v1518_v48, %v4489_v45  ;;  %v1520_v50 = vsel %vm1519_vm9, %v1517_v47, %v4488_v46  ;;  %v3906_v48 = vld [vmem:[%s4849_s16 + $0x3] ss:$0 sm:$0xff] }
 0xbf2   : > { %v1522_v51 = vpack.c.bf16 %v1521_v49, %v1520_v50  ;;  %v1650_v50 = vld [vmem:[%s4828_s25 + $0x90] sm:$0xff] }
 0xbf4   : > { %4422 = vmatmul.mubr.msk.bf16.vlgmr.msra.gmra.mrb[32].mxu1 %vm553_vm5, %v1522_v51  ;;  %v1658_v51 = vld [vmem:[%s4828_s25 + $0xd0] sm:$0xff] }
 0xbf5   : > { %1955 = vmatpush1.bf16.msra.mxu1 %v3909_v17  ;;  %1986 = vmatprep.mubr.bf16.mxu1 %v4736_v31  ;;  %v3920_v17 = vcombine.high %v1638_v21, %v1646_v58 }
 0xbf6   : > { %1956 = vmatprep.subr.bf16.mxu1 %v3926_v27  ;;  %v3938_v27 = vcombine.high %v1655_v22, %v1663_v23 }
 0xbf9   : > { %1957 = vmatpush1.bf16.msra.mxu1 %v3925_v26  ;;  %v3936_v26 = vcombine.high %v1654_v19, %v1662_v20 }
 0xbfa   : > { %2040 = vmatprep.subr.bf16.mxu1 %v3914_v37  ;;  %v4499_v37 = vld [vmem:[%s4834_s29 + $0xc8] sm:$0xff]  }
 0xcc7   : > { %v1581_v53 = vpop.f32.mrb[32].mxu1 }
 0xcc8   : > { %v1582_v54 = vadd.f32 %v3901_v52, %v1581_v53  ;;  %v4423_v55 = vpop.f32.mrb[33].mxu1  ;;  %v1659_v53 = vld [vmem:[%s4828_s25 + $0xd8] sm:$0xff] }
 0xcc9   : > { %v1584_v56 = vpop.f32.mrb[34].mxu1 }
 0xcca   : > { %v1585_v57 = vadd.f32 %v3901_v52, %v1584_v56  ;;  %v4424_v59 = vpop.f32.mrb[35].mxu1  ;;  %v1588_v60 = vadd.f32 %v4662_v12, %v1582_v54  ;;  %v1651_v52 = vld [vmem:[%s4828_s25 + $0x98] sm:$0xff]  ;;  %v1636_v12 = vld [vmem:[%s4828_s25 + $0x20] sm:$0xff] }
 0xccb   : > { %v3930_v59 = vcombine.high %v1651_v52, %v1659_v53 }
 0xccc   : > { %v1592_v7 = vsel %vm553_vm5, %v1588_v60, 0.0  ;;  %v1589_v0 = vadd.f32 %v4663_v61, %v1585_v57  ;;  %v3928_v57 = vcombine.high %v1650_v50, %v1658_v51  ;;  %v1645_v61 = vld [vmem:[%s4828_s25 + $0x68] sm:$0xff] }
 0xccd   : > { %1593 = vadd.xlane.f32.xlu1 %v1592_v7  ;;  %v1637_v7 = vld [vmem:[%s4828_s25 + $0x28] sm:$0xff] }
 0xcce   : > { %v1595_v1 = vsel %vm553_vm5, %v1589_v0, 0.0 }
 0xccf   : > { %1596 = vadd.xlane.f32.xlu0 %v1595_v1  ;;  %v3929_v1 = vcombine.low %v1651_v52, %v1659_v53  ;;  %v4517_v52 = vld [vmem:[%s4834_s29 + $0xa8] sm:$0xff]   ;;  %v4518_v53 = vld [vmem:[%s4834_s29 + $0x70] sm:$0xff]  }
 0xd5a   : > { %v1594_v2 = vpop.xlane.xlu1 %1593 }
 0xd5b   : > { %v1599_v3 = vmul.f32 0.03125, %v1594_v2 }
 0xd5c   : > { %v1597_v4 = vpop.xlane.xlu0 %1596 }
 0xd5d   : > { %v1601_v5 = vsub.f32 %v1588_v60, %v1599_v3  ;;  %v1600_v6 = vmul.f32 0.03125, %v1597_v4  ;;  %v1644_v60 = vld [vmem:[%s4828_s25 + $0x60] sm:$0xff]  ;;  %v3918_v3 = vcombine.high %v1637_v7, %v1645_v61 }
 0xd5e   : > { %v3916_v2 = vcombine.high %v1636_v12, %v1644_v60  ;;  %v1652_v4 = vld [vmem:[%s4828_s25 + $0xa0] sm:$0xff] }
 0xd5f   : > { %v1602_v8 = vsub.f32 %v1589_v0, %v1600_v6  ;;  %v1603_v9 = vmul.f32 %v1601_v5, %v1601_v5  ;;  %v3927_v0 = vcombine.low %v1650_v50, %v1658_v51  ;;  %v1653_v6 = vld [vmem:[%s4828_s25 + $0xa8] sm:$0xff] }
 0xd60   : > { %v4515_v50 = vld [vmem:[%s4834_s29 + $0xe8] sm:$0xff]  }
 0xd61   : > { %v1605_v10 = vsel %vm553_vm5, %v1603_v9, 0.0  ;;  %v1604_v13 = vmul.f32 %v1602_v8, %v1602_v8  ;;  %v3915_v9 = vcombine.low %v1636_v12, %v1644_v60  ;;  %v4516_v51 = vld [vmem:[%s4834_s29 + $0x28] sm:$0xff]   ;;  %v4522_v12 = vld [vmem:[%s4834_s29 + $0x78] sm:$0xff]  }
 0xd62   : > { %1606 = vadd.xlane.f32.xlu0 %v1605_v10  ;;  %v3917_v10 = vcombine.low %v1637_v7, %v1645_v61  ;;  %v4523_v60 = vld [vmem:[%s4834_s29 + $0xf8] sm:$0xff]  }
 0xd63   : > { %v1608_v14 = vsel %vm553_vm5, %v1604_v13, 0.0  ;;  %v4524_v7 = vld [vmem:[%s4834_s29 + $0x38] sm:$0xff]  }
 0xd64   : > { %1609 = vadd.xlane.f32.xlu1 %v1608_v14  ;;  %v4525_v61 = vld [vmem:[%s4834_s29 + $0xb8] sm:$0xff]  }
 0xdef   : > { %v1607_v38 = vpop.xlane.xlu0 %1606 }
 0xdf0   : > { %v1611_v39 = vmul.f32 0.03125, %v1607_v38  ;;  %v4501_v38 = vld [vmem:[%s4834_s29 + $0x88] sm:$0xff]  }
 0xdf1   : > { %v1610_v40 = vpop.xlane.xlu1 %1609 }
 0xdf2   : > { %v1613_v41 = vadd.f32 1e-05, %v1611_v39  ;;  %v1612_v30 = vmul.f32 0.03125, %v1610_v40  ;;  %v4502_v39 = vld [vmem:[%s4834_s29 + $0x50] sm:$0xff]  }
 0xdf3   : > { %v4503_v40 = vld [vmem:[%s4834_s29 + $0xd0] sm:$0xff]  }
 0xdf4   : > { %4654 = vrsqrt.f32 %v1613_v41  ;;  %v1614_v11 = vadd.f32 1e-05, %v1612_v30  ;;  %v4504_v41 = vld [vmem:[%s4834_s29 + $0x10] sm:$0xff]  }
 0xdf5   : > { %v4505_v30 = vld [vmem:[%s4834_s29 + $0x90] sm:$0xff]  }
 0xdf6   : > { %4656 = vrsqrt.f32 %v1614_v11  ;;  %v4506_v11 = vld [vmem:[%s4834_s29 + $0x58] sm:$0xff]  }
 0xdfe   : > { %v4655_v42 = vpop.eup %4654 }
 0xdff   : > { %v1617_v44 = vmul.f32 %v4655_v42, %v1601_v5  ;;  %v1660_v5 = vld [vmem:[%s4828_s25 + $0xe0] sm:$0xff]  ;;  %v4507_v42 = vld [vmem:[%s4834_s29 + $0xd8] sm:$0xff]  }
 0xe00   : > { %v4657_v45 = vpop.eup %4656  ;;  %v3932_v13 = vcombine.high %v1652_v4, %v1660_v5  ;;  %v3931_v15 = vcombine.low %v1652_v4, %v1660_v5  ;;  %v5134_v5 = vld [vmem:[%s4843_s20 + $0x8] sm:$0xff] }
 0xe01   : > { %v1623_v46 = vmul.f32 %v3905_v43, %v1617_v44  ;;  %v1618_v47 = vmul.f32 %v4657_v45, %v1602_v8  ;;  %v1661_v8 = vld [vmem:[%s4828_s25 + $0xe8] sm:$0xff]  ;;  %v4509_v44 = vld [vmem:[%s4834_s29 + $0x98] sm:$0xff]   ;;  %v4510_v45 = vld [vmem:[%s4834_s29 + $0x60] sm:$0xff]  }
 0xe02   : > { %v3934_v14 = vcombine.high %v1653_v6, %v1661_v8  ;;  %v3933_v16 = vcombine.low %v1653_v6, %v1661_v8 }
 0xe03   : > { %v1624_v49 = vmul.f32 %v3905_v43, %v1618_v47  ;;  %v5050_v54 = vadd.f32 %v3906_v48, %v1623_v46  ;;  %v4508_v43 = vld [vmem:[%s4834_s29 + $0x18] sm:$0xff]   ;;  %v4511_v46 = vld [vmem:[%s4834_s29 + $0xe0] sm:$0xff]  }
 0xe04   : > { %v4512_v47 = vld [vmem:[%s4834_s29 + $0x20] sm:$0xff]  }
 0xe05   : > { %v5052_v55 = vadd.f32 %v3906_v48, %v1624_v49  ;;  %v4513_v48 = vld [vmem:[%s4834_s29 + $0xa0] sm:$0xff]   ;;  %v4514_v49 = vld [vmem:[%s4834_s29 + $0x68] sm:$0xff]  }
 0xe07   : > { %v5056_v56 = vpack.c.bf16 %v5052_v55, %v5050_v54 }
 0xe09   : > { %3939 = vmatmul.mubr.msk.bf16.vlgmr.msra.gmra.mrb[36].mxu0 %vm553_vm5, %v5056_v56  ;;  %3940 = vmatmul.mubr.msk.bf16.vlgmr.msra.gmra.mrb[36].mxu1 %vm553_vm5, %v5056_v56 }
 0xe0a   : > { %1998 = vmatpush1.bf16.msra.mxu0 %v3911_v35  ;;  %2041 = vmatpush1.bf16.msra.mxu1 %v3913_v36  ;;  %v4497_v35 = vld [vmem:[%s4834_s29 + $0x80] sm:$0xff]   ;;  %v4498_v36 = vld [vmem:[%s4834_s29 + $0x48] sm:$0xff]  }
 0xe0b   : > { %1999 = vmatprep.subr.bf16.mxu0 %v3928_v57  ;;  %2042 = vmatprep.subr.bf16.mxu1 %v3930_v59  ;;  %v4520_v57 = vld [vmem:[%s4834_s29 + $0x30] sm:$0xff]  }
 0xe0c   : > { %2029 = vmatprep.mubr.bf16.mxu0 %v4736_v31  ;;  %2072 = vmatprep.mubr.bf16.mxu1 %v4736_v31  ;;  %v4521_v59 = vld [vmem:[%s4834_s29 + $0xb0] sm:$0xff]  }
 0xe0e   : > { %2000 = vmatpush1.bf16.msra.mxu0 %v3927_v0  ;;  %2043 = vmatpush1.bf16.msra.mxu1 %v3929_v1  ;;  %v4526_v0 = vld [vmem:[%s4834_s29 + $0x140] sm:$0xff]  }
 0xe0f   : > { %2083 = vmatprep.subr.bf16.mxu0 %v3916_v2  ;;  %2126 = vmatprep.subr.bf16.mxu1 %v3918_v3  ;;  %v4527_v1 = vld [vmem:[%s4834_s29 + $0x1c0] sm:$0xff]   ;;  %v1668_v2 = vlaneseq }
 0xe11   : > { %3941 = vmatmul.mubr.msk.bf16.vlgmr.msra.gmra.mrb[40].mxu0 %vm553_vm5, %v5056_v56  ;;  %3942 = vmatmul.mubr.msk.bf16.vlgmr.msra.gmra.mrb[40].mxu1 %vm553_vm5, %v5056_v56  ;;  %v5130_v3 = vshrl.u32 %v1668_v2, 7 }
 0xe12   : > { %2084 = vmatpush1.bf16.msra.mxu0 %v3915_v9  ;;  %2127 = vmatpush1.bf16.msra.mxu1 %v3917_v10  ;;  %v1664_v10 = vld [vmem:[%s4843_s20] sm:$0xff] }
 0xe13   : > { %2085 = vmatprep.subr.bf16.mxu0 %v3932_v13  ;;  %2128 = vmatprep.subr.bf16.mxu1 %v3934_v14  ;;  %v1694_v4 = vsub.s32 6, %v5130_v3  ;;  %v1670_v8 = vsub.s32 0, %v5130_v3  ;;  %v1678_v9 = vsub.s32 2, %v5130_v3  ;;  %v1674_v13 = vsub.s32 1, %v5130_v3 }
 0xe14   : > { %2115 = vmatprep.mubr.bf16.mxu0 %v4736_v31  ;;  %2158 = vmatprep.mubr.bf16.mxu1 %v4736_v31  ;;  %v1682_v14 = vsub.s32 3, %v5130_v3  ;;  %v1698_v19 = vsub.s32 7, %v5130_v3 }
 0xe15   : > { %v5137_v6 = vrot.slane %v5134_v5, %v1694_v4  ;;  %v1671_v21 = vrot.slane %v1664_v10, %v1670_v8  ;;  %v1679_v58 = vrot.slane %v1664_v10, %v1678_v9  ;;  %v1675_v62 = vrot.slane %v1664_v10, %v1674_v13 }
 0xe16   : > { %2086 = vmatpush1.bf16.msra.mxu0 %v3931_v15  ;;  %2129 = vmatpush1.bf16.msra.mxu1 %v3933_v16  ;;  %v1683_v63 = vrot.slane %v1664_v10, %v1682_v14  ;;  %v1686_v15 = vsub.s32 4, %v5130_v3 }
 0xe17   : > { %2169 = vmatprep.subr.bf16.mxu0 %v3920_v17  ;;  %2212 = vmatprep.subr.bf16.mxu1 %v3922_v18  ;;  %v1690_v18 = vsub.s32 5, %v5130_v3 }
 0xe19   : > { %3943 = vmatmul.mubr.msk.bf16.vlgmr.msra.gmra.mrb[44].mxu0 %vm553_vm5, %v5056_v56  ;;  %3944 = vmatmul.mubr.msk.bf16.vlgmr.msra.gmra.mrb[44].mxu1 %vm553_vm5, %v5056_v56 }
 0xe1a   : > { %2170 = vmatpush1.bf16.msra.mxu0 %v3919_v25  ;;  %2213 = vmatpush1.bf16.msra.mxu1 %v3921_v24 }
 0xe1b   : > { %2171 = vmatprep.subr.bf16.mxu0 %v3936_v26  ;;  %2214 = vmatprep.subr.bf16.mxu1 %v3938_v27 }
 0xe1c   : > { %2201 = vmatprep.mubr.bf16.mxu0 %v4736_v31  ;;  %2244 = vmatprep.mubr.bf16.mxu1 %v4736_v31  ;;  %v4500_v31 = vld [vmem:[%s4834_s29 + $0x8] sm:$0xff]  }
 0xe1e   : > { %2172 = vmatpush1.bf16.msra.mxu0 %v3935_v28  ;;  %2215 = vmatpush1.bf16.msra.mxu1 %v3937_v32 }
 0xe1f   : > { %4131 = vmatprep.subr.bf16.mxu0 %v4494_v29  ;;  %4153 = vmatprep.subr.bf16.mxu1 %v4495_v33 }
 0xe21   : > { %3945 = vmatmul.mubr.msk.bf16.vlgmr.msra.gmra.mrb[48].mxu0 %vm553_vm5, %v5056_v56  ;;  %3946 = vmatmul.mubr.msk.bf16.vlgmr.msra.gmra.mrb[48].mxu1 %vm553_vm5, %v5056_v56  ;;  %v4519_v56 = vld [vmem:[%s4834_s29 + $0xf0] sm:$0xff]  }
 0xe22   : > { %4132 = vmatpush3.bf16.msra.mxu0 %v4496_v34  ;;  %4154 = vmatpush3.bf16.msra.mxu1 %v4497_v35  ;;  %v1687_v35 = vrot.slane %v1664_v10, %v1686_v15 }
 0xe23   : > { %4133 = vmatprep.subr.bf16.mxu0 %v4498_v36  ;;  %4155 = vmatprep.subr.bf16.mxu1 %v4499_v37  ;;  %v1695_v36 = vrot.slane %v1664_v10, %v1694_v4 }
 0xe26   : > { %4134 = vmatpush3.bf16.msra.mxu0 %v4500_v31  ;;  %4156 = vmatpush3.bf16.msra.mxu1 %v4501_v38  ;;  %v1691_v38 = vrot.slane %v1664_v10, %v1690_v18 }
 0xe27   : > { %4135 = vmatprep.subr.bf16.mxu0 %v4502_v39  ;;  %4157 = vmatprep.subr.bf16.mxu1 %v4503_v40  ;;  %v1699_v39 = vrot.slane %v1664_v10, %v1698_v19  ;;  %v1711_v10 = vrot.slane %v5134_v5, %v1678_v9  ;;  %v1715_v9 = vrot.slane %v5134_v5, %v1682_v14 }
 0xe2a   : > { %4136 = vmatpush3.bf16.msra.mxu0 %v4504_v41  ;;  %4158 = vmatpush3.bf16.msra.mxu1 %v4505_v30 }
 0xe2b   : > { %4137 = vmatprep.subr.bf16.mxu0 %v4506_v11  ;;  %4159 = vmatprep.subr.bf16.mxu1 %v4507_v42 }
 0xe2e   : > { %4138 = vmatpush3.bf16.msra.mxu0 %v4508_v43  ;;  %4160 = vmatpush3.bf16.msra.mxu1 %v4509_v44 }
 0xe2f   : > { %4139 = vmatprep.subr.bf16.mxu0 %v4510_v45  ;;  %4161 = vmatprep.subr.bf16.mxu1 %v4511_v46 }
 0xe32   : > { %4140 = vmatpush3.bf16.msra.mxu0 %v4512_v47  ;;  %4162 = vmatpush3.bf16.msra.mxu1 %v4513_v48 }
 0xe33   : > { %4141 = vmatprep.subr.bf16.mxu0 %v4514_v49  ;;  %4163 = vmatprep.subr.bf16.mxu1 %v4515_v50 }
 0xe36   : > { %4142 = vmatpush3.bf16.msra.mxu0 %v4516_v51  ;;  %4164 = vmatpush3.bf16.msra.mxu1 %v4517_v52  ;;  %v4528_v52 = vld [vmem:[%s4834_s29 + $0x100] sm:$0xff]  }
 0xe37   : > { %4143 = vmatprep.subr.bf16.mxu0 %v4518_v53  ;;  %4165 = vmatprep.subr.bf16.mxu1 %v4519_v56  ;;  %v4529_v53 = vld [vmem:[%s4834_s29 + $0x180] sm:$0xff]  }
 0xe3a   : > { %4144 = vmatpush3.bf16.msra.mxu0 %v4520_v57  ;;  %4166 = vmatpush3.bf16.msra.mxu1 %v4521_v59 }
 0xe3b   : > { %4145 = vmatprep.subr.bf16.mxu0 %v4522_v12  ;;  %4167 = vmatprep.subr.bf16.mxu1 %v4523_v60  ;;  %v4530_v60 = vld [vmem:[%s4834_s29 + $0x148] sm:$0xff]  }
 0xe3e   : > { %4146 = vmatpush3.bf16.msra.mxu0 %v4524_v7  ;;  %4168 = vmatpush3.bf16.msra.mxu1 %v4525_v61  ;;  %v4531_v7 = vld [vmem:[%s4834_s29 + $0x1c8] sm:$0xff]   ;;  %v1703_v61 = vrot.slane %v5134_v5, %v1670_v8  ;;  %v1707_v8 = vrot.slane %v5134_v5, %v1674_v13  ;;  %v4535_v13 = vld [vmem:[%s4834_s29 + $0x1d0] sm:$0xff]  }
 0xe3f   : > { %4175 = vmatprep.subr.bf16.mxu0 %v4526_v0  ;;  %4197 = vmatprep.subr.bf16.mxu1 %v4527_v1 }
 0xedc   : > { %v1945_v16 = vpop.f32.mrb[36].mxu0  ;;  %v1988_v17 = vpop.f32.mrb[36].mxu1 }
 0xedd   : > { %v1946_v20 = vadd.f32 %v1945_v16, %v1671_v21  ;;  %v1989_v22 = vadd.f32 %v1988_v17, %v1679_v58  ;;  %v1947_v23 = vpop.f32.mrb[37].mxu0  ;;  %v1990_v25 = vpop.f32.mrb[37].mxu1 }
 0xede   : > { %v1948_v24 = vadd.f32 %v1947_v23, %v1675_v62  ;;  %v1991_v26 = vadd.f32 %v1990_v25, %v1683_v63  ;;  %v1949_v27 = vpop.f32.mrb[38].mxu0  ;;  %v1992_v28 = vpop.f32.mrb[38].mxu1 }
 0xedf   : > { %v1950_v32 = vadd.f32 %v1949_v27, %v1671_v21  ;;  %v1993_v29 = vadd.f32 %v1992_v28, %v1679_v58  ;;  %v1951_v33 = vpop.f32.mrb[39].mxu0  ;;  %v1994_v34 = vpop.f32.mrb[39].mxu1  ;;  %v2255_v40 = vmax.f32 %v1946_v20, 0.0  ;;  %v2257_v41 = vmax.f32 %v1989_v22, 0.0  ;;  %v4532_v20 = vld [vmem:[%s4834_s29 + $0x108] sm:$0xff]   ;;  %v4534_v27 = vld [vmem:[%s4834_s29 + $0x150] sm:$0xff]  }
 0xee0   : > { %v1952_v37 = vadd.f32 %v1951_v33, %v1675_v62  ;;  %v1995_v31 = vadd.f32 %v1994_v34, %v1683_v63  ;;  %v2256_v42 = vmax.f32 %v1948_v24, 0.0  ;;  %v2258_v43 = vmax.f32 %v1991_v26, 0.0  ;;  %v4533_v22 = vld [vmem:[%s4834_s29 + $0x188] sm:$0xff]  }
 0xee1   : > { %v2271_v30 = vmax.f32 %v1950_v32, 0.0  ;;  %v2273_v11 = vmax.f32 %v1993_v29, 0.0 }
 0xee2   : > { %v2272_v44 = vmax.f32 %v1952_v37, 0.0  ;;  %v2274_v45 = vmax.f32 %v1995_v31, 0.0 }
 0xee3   : > { %v2287_v46 = vpack.c.bf16 %v2271_v30, %v2255_v40  ;;  %v2289_v47 = vpack.c.bf16 %v2273_v11, %v2257_v41 }
 0xee4   : > { %v2288_v48 = vpack.c.bf16 %v2272_v44, %v2256_v42  ;;  %v2290_v49 = vpack.c.bf16 %v2274_v45, %v2258_v43  ;;  %v2031_v50 = vpop.f32.mrb[40].mxu0  ;;  %v2074_v51 = vpop.f32.mrb[40].mxu1  ;;  %v4538_v42 = vld [vmem:[%s4834_s29 + $0x158] sm:$0xff]  }
 0xee5   : > { %v2032_v56 = vadd.f32 %v2031_v50, %v1687_v35  ;;  %v2075_v57 = vadd.f32 %v2074_v51, %v1695_v36  ;;  %v2033_v59 = vpop.f32.mrb[41].mxu0  ;;  %v2076_v12 = vpop.f32.mrb[41].mxu1  ;;  %v4539_v43 = vld [vmem:[%s4834_s29 + $0x1d8] sm:$0xff]  }
 0xee6   : > { %v2034_v0 = vadd.f32 %v2033_v59, %v1691_v38  ;;  %v2077_v1 = vadd.f32 %v2076_v12, %v1699_v39  ;;  %v2035_v2 = vpop.f32.mrb[42].mxu0  ;;  %v2078_v4 = vpop.f32.mrb[42].mxu1  ;;  %3364 = vmatprep.mubr.bf16.mxu0 %v2288_v48  ;;  %3405 = vmatprep.mubr.bf16.mxu1 %v2290_v49  ;;  %v4540_v59 = vld [vmem:[%s4834_s29 + $0x118] sm:$0xff]  }
 0xee7   : > { %v2036_v21 = vadd.f32 %v2035_v2, %v1687_v35  ;;  %v2079_v58 = vadd.f32 %v2078_v4, %v1695_v36  ;;  %v2037_v62 = vpop.f32.mrb[43].mxu0  ;;  %v2080_v63 = vpop.f32.mrb[43].mxu1  ;;  %3365 = vmatmul.mubr.bf16.vlgmr.msra.gmra.mrb[52].mxu0 %v2287_v46  ;;  %3406 = vmatmul.mubr.bf16.vlgmr.msra.gmra.mrb[52].mxu1 %v2289_v47  ;;  %v2259_v23 = vmax.f32 %v2032_v56, 0.0  ;;  %v2261_v25 = vmax.f32 %v2075_v57, 0.0  ;;  %v4541_v12 = vld [vmem:[%s4834_s29 + $0x198] sm:$0xff]  }
 0xee8   : > { %v2038_v16 = vadd.f32 %v2037_v62, %v1691_v38  ;;  %v2081_v17 = vadd.f32 %v2080_v63, %v1699_v39  ;;  %4176 = vmatpush3.bf16.msra.mxu0 %v4528_v52  ;;  %4198 = vmatpush3.bf16.msra.mxu1 %v4529_v53  ;;  %v2260_v28 = vmax.f32 %v2034_v0, 0.0  ;;  %v2262_v32 = vmax.f32 %v2077_v1, 0.0  ;;  %v4536_v38 = vld [vmem:[%s4834_s29 + $0x110] sm:$0xff]  }
 0xee9   : > { %v2275_v24 = vmax.f32 %v2036_v21, 0.0  ;;  %v2277_v26 = vmax.f32 %v2079_v58, 0.0  ;;  %4177 = vmatprep.subr.bf16.mxu0 %v4530_v60  ;;  %4199 = vmatprep.subr.bf16.mxu1 %v4531_v7  ;;  %v4537_v39 = vld [vmem:[%s4834_s29 + $0x190] sm:$0xff]   ;;  %v1719_v52 = vrot.slane %v5134_v5, %v1686_v15  ;;  %v1723_v53 = vrot.slane %v5134_v5, %v1690_v18  ;;  %v4542_v15 = vld [vmem:[%s4834_s29 + $0x160] sm:$0xff]  }
 0xeea   : > { %v2276_v29 = vmax.f32 %v2038_v16, 0.0  ;;  %v2278_v33 = vmax.f32 %v2081_v17, 0.0  ;;  %v1731_v60 = vrot.slane %v5134_v5, %v1698_v19  ;;  %v4543_v18 = vld [vmem:[%s4834_s29 + $0x1e0] sm:$0xff]  }
 0xeeb   : > { %v5173_v34 = vpack.c.bf16 %v2275_v24, %v2259_v23  ;;  %v5175_v35 = vpack.c.bf16 %v2277_v26, %v2261_v25  ;;  %v4545_v16 = vld [vmem:[%s4834_s29 + $0x1a0] sm:$0xff]   ;;  %v4546_v23 = vld [vmem:[%s4834_s29 + $0x168] sm:$0xff]  }
 0xeec   : > { %v2292_v14 = vpack.c.bf16 %v2276_v29, %v2260_v28  ;;  %v2294_v36 = vpack.c.bf16 %v2278_v33, %v2262_v32  ;;  %4178 = vmatpush3.bf16.msra.mxu0 %v4532_v20  ;;  %4200 = vmatpush3.bf16.msra.mxu1 %v4533_v22  ;;  %v2117_v37 = vpop.f32.mrb[44].mxu0  ;;  %v2160_v31 = vpop.f32.mrb[44].mxu1  ;;  %v4547_v25 = vld [vmem:[%s4834_s29 + $0x1e8] sm:$0xff]  }
 0xeed   : > { %v2118_v40 = vadd.f32 %v2117_v37, %v1703_v61  ;;  %v2161_v41 = vadd.f32 %v2160_v31, %v1711_v10  ;;  %v2119_v30 = vpop.f32.mrb[45].mxu0  ;;  %v2162_v11 = vpop.f32.mrb[45].mxu1  ;;  %4179 = vmatprep.subr.bf16.mxu0 %v4534_v27  ;;  %4201 = vmatprep.subr.bf16.mxu1 %v4535_v13  ;;  %v4548_v37 = vld [vmem:[%s4834_s29 + $0x128] sm:$0xff]  }
 0xeee   : > { %v2120_v44 = vadd.f32 %v2119_v30, %v1707_v8  ;;  %v2163_v45 = vadd.f32 %v2162_v11, %v1715_v9  ;;  %v2121_v46 = vpop.f32.mrb[46].mxu0  ;;  %v2164_v47 = vpop.f32.mrb[46].mxu1  ;;  %3446 = vmatprep.mubr.bf16.mxu0 %v2292_v14  ;;  %3487 = vmatprep.mubr.bf16.mxu1 %v2294_v36  ;;  %v4549_v31 = vld [vmem:[%s4834_s29 + $0x1a8] sm:$0xff]   ;;  %v4550_v30 = vld [vmem:[%s4834_s29 + $0x170] sm:$0xff]  }
 0xeef   : > { %v2122_v48 = vadd.f32 %v2121_v46, %v1703_v61  ;;  %v2165_v49 = vadd.f32 %v2164_v47, %v1711_v10  ;;  %v2123_v50 = vpop.f32.mrb[47].mxu0  ;;  %v2166_v51 = vpop.f32.mrb[47].mxu1  ;;  %v2263_v7 = vmax.f32 %v2118_v40, 0.0  ;;  %v2265_v61 = vmax.f32 %v2161_v41, 0.0 }
 0xef0   : > { %v2124_v56 = vadd.f32 %v2123_v50, %v1707_v8  ;;  %v2167_v57 = vadd.f32 %v2166_v51, %v1715_v9  ;;  %4180 = vmatpush3.bf16.msra.mxu0 %v4536_v38  ;;  %4202 = vmatpush3.bf16.msra.mxu1 %v4537_v39  ;;  %v2264_v2 = vmax.f32 %v2120_v44, 0.0  ;;  %v2266_v4 = vmax.f32 %v2163_v45, 0.0  ;;  %v4544_v8 = vld [vmem:[%s4834_s29 + $0x120] sm:$0xff]   ;;  %v4553_v50 = vld [vmem:[%s4834_s29 + $0x1b0] sm:$0xff]   ;;  %v4554_v51 = vld [vmem:[%s4834_s29 + $0x178] sm:$0xff]  }
 0xef1   : > { %v2279_v0 = vmax.f32 %v2122_v48, 0.0  ;;  %v2281_v1 = vmax.f32 %v2165_v49, 0.0  ;;  %4181 = vmatprep.subr.bf16.mxu0 %v4538_v42  ;;  %4203 = vmatprep.subr.bf16.mxu1 %v4539_v43  ;;  %v4552_v49 = vld [vmem:[%s4834_s29 + $0x130] sm:$0xff]  }
 0xef2   : > { %v2280_v10 = vmax.f32 %v2124_v56, 0.0  ;;  %v2282_v21 = vmax.f32 %v2167_v57, 0.0  ;;  %v4557_v56 = vld [vmem:[%s4834_s29 + $0x1b8] sm:$0xff]   ;;  %v4558_v57 = vld [vmem:[%s4834_s29 + $0x240] sm:$0xff]  }
 0xef3   : > { %v5194_v58 = vpack.c.bf16 %v2279_v0, %v2263_v7  ;;  %v5196_v3 = vpack.c.bf16 %v2281_v1, %v2265_v61  ;;  %v4562_v7 = vld [vmem:[%s4834_s29 + $0x248] sm:$0xff]  }
 0xef4   : > { %v5198_v5 = vpack.c.bf16 %v2280_v10, %v2264_v2  ;;  %v5200_v19 = vpack.c.bf16 %v2282_v21, %v2266_v4  ;;  %4182 = vmatpush3.bf16.msra.mxu0 %v4540_v59  ;;  %4204 = vmatpush3.bf16.msra.mxu1 %v4541_v12  ;;  %v2203_v62 = vpop.f32.mrb[48].mxu0  ;;  %v2246_v63 = vpop.f32.mrb[48].mxu1  ;;  %v4559_v59 = vld [vmem:[%s4834_s29 + $0x2c0] sm:$0xff]   ;;  %v4563_v61 = vld [vmem:[%s4834_s29 + $0x2c8] sm:$0xff]   ;;  %v4570_v2 = vld [vmem:[%s4834_s29 + $0x258] sm:$0xff]  }
 0xef5   : > { %v2204_v17 = vadd.f32 %v2203_v62, %v1719_v52  ;;  %v2247_v20 = vadd.f32 %v2246_v63, %v5137_v6  ;;  %v2205_v22 = vpop.f32.mrb[49].mxu0  ;;  %v2248_v9 = vpop.f32.mrb[49].mxu1  ;;  %4183 = vmatprep.subr.bf16.mxu0 %v4542_v15  ;;  %4205 = vmatprep.subr.bf16.mxu1 %v4543_v18  ;;  %v4560_v12 = vld [vmem:[%s4834_s29 + $0x200] sm:$0xff]   ;;  %v4564_v0 = vld [vmem:[%s4834_s29 + $0x208] sm:$0xff]   ;;  %v4566_v15 = vld [vmem:[%s4834_s29 + $0x250] sm:$0xff]  }
 0xef6   : > { %v2206_v24 = vadd.f32 %v2205_v22, %v1723_v53  ;;  %v2249_v26 = vadd.f32 %v2248_v9, %v1731_v60  ;;  %v2207_v27 = vpop.f32.mrb[50].mxu0  ;;  %v2250_v13 = vpop.f32.mrb[50].mxu1  ;;  %v4565_v1 = vld [vmem:[%s4834_s29 + $0x288] sm:$0xff]   ;;  %v4569_v18 = vld [vmem:[%s4834_s29 + $0x290] sm:$0xff]   ;;  %v4571_v4 = vld [vmem:[%s4834_s29 + $0x2d8] sm:$0xff]  }
 0xef7   : > { %v2208_v28 = vadd.f32 %v2207_v27, %v1719_v52  ;;  %v2251_v32 = vadd.f32 %v2250_v13, %v5137_v6  ;;  %v2209_v29 = vpop.f32.mrb[51].mxu0  ;;  %v2252_v33 = vpop.f32.mrb[51].mxu1  ;;  %v2267_v38 = vmax.f32 %v2204_v17, 0.0  ;;  %v2269_v39 = vmax.f32 %v2247_v20, 0.0  ;;  %v4551_v6 = vld [vmem:[%s4834_s29 + $0x1f0] sm:$0xff]   ;;  %v4555_v52 = vld [vmem:[%s4834_s29 + $0x1f8] sm:$0xff]  }
 0xef8   : > { %v2210_v14 = vadd.f32 %v2209_v29, %v1723_v53  ;;  %v2253_v36 = vadd.f32 %v2252_v33, %v1731_v60  ;;  %4184 = vmatpush3.bf16.msra.mxu0 %v4544_v8  ;;  %4206 = vmatpush3.bf16.msra.mxu1 %v4545_v16  ;;  %v2268_v11 = vmax.f32 %v2206_v24, 0.0  ;;  %v2270_v42 = vmax.f32 %v2249_v26, 0.0  ;;  %v4556_v53 = vld [vmem:[%s4834_s29 + $0x138] sm:$0xff]   ;;  %v4561_v60 = vld [vmem:[%s4834_s29 + $0x280] sm:$0xff]   ;;  %v4578_v8 = vld [vmem:[%s4834_s29 + $0x268] sm:$0xff]  }
 0xef9   : > { %v2283_v40 = vmax.f32 %v2208_v28, 0.0  ;;  %v2285_v41 = vmax.f32 %v2251_v32, 0.0  ;;  %4185 = vmatprep.subr.bf16.mxu0 %v4546_v23  ;;  %4207 = vmatprep.subr.bf16.mxu1 %v4547_v25  ;;  %v4572_v10 = vld [vmem:[%s4834_s29 + $0x218] sm:$0xff]   ;;  %v4576_v62 = vld [vmem:[%s4834_s29 + $0x220] sm:$0xff]   ;;  %v4579_v16 = vld [vmem:[%s4834_s29 + $0x2e8] sm:$0xff]  }
 0xefa   : > { %v2284_v43 = vmax.f32 %v2210_v14, 0.0  ;;  %v2286_v44 = vmax.f32 %v2253_v36, 0.0  ;;  %v4573_v21 = vld [vmem:[%s4834_s29 + $0x298] sm:$0xff]   ;;  %v4577_v63 = vld [vmem:[%s4834_s29 + $0x2a0] sm:$0xff]   ;;  %v4580_v17 = vld [vmem:[%s4834_s29 + $0x228] sm:$0xff]  }
 0xefb   : > { %v5212_v45 = vpack.c.bf16 %v2283_v40, %v2267_v38  ;;  %v5214_v46 = vpack.c.bf16 %v2285_v41, %v2269_v39  ;;  %v4581_v20 = vld [vmem:[%s4834_s29 + $0x2a8] sm:$0xff]   ;;  %v4582_v22 = vld [vmem:[%s4834_s29 + $0x270] sm:$0xff]   ;;  %v4586_v24 = vld [vmem:[%s4834_s29 + $0x278] sm:$0xff]  }
 0xefc   : > { %v5216_v47 = vpack.c.bf16 %v2284_v43, %v2268_v11  ;;  %v5218_v48 = vpack.c.bf16 %v2286_v44, %v2270_v42  ;;  %4186 = vmatpush3.bf16.msra.mxu0 %v4548_v37  ;;  %4208 = vmatpush3.bf16.msra.mxu1 %v4549_v31  ;;  %v4583_v9 = vld [vmem:[%s4834_s29 + $0x2f0] sm:$0xff]   ;;  %v4587_v26 = vld [vmem:[%s4834_s29 + $0x2f8] sm:$0xff]   ;;  %v4590_v28 = vld [vmem:[%s4834_s29 + $0x340] sm:$0xff]  }
 0xefd   : > { %4187 = vmatprep.subr.bf16.mxu0 %v4550_v30  ;;  %4209 = vmatprep.subr.bf16.mxu1 %v4551_v6  ;;  %v4584_v23 = vld [vmem:[%s4834_s29 + $0x230] sm:$0xff]   ;;  %v4588_v27 = vld [vmem:[%s4834_s29 + $0x238] sm:$0xff]   ;;  %v4591_v32 = vld [vmem:[%s4834_s29 + $0x3c0] sm:$0xff]  }
 0xefe   : > { %v4585_v25 = vld [vmem:[%s4834_s29 + $0x2b0] sm:$0xff]   ;;  %v4589_v13 = vld [vmem:[%s4834_s29 + $0x2b8] sm:$0xff]   ;;  %v4592_v29 = vld [vmem:[%s4834_s29 + $0x300] sm:$0xff]  }
 0xeff   : > { %v4593_v33 = vld [vmem:[%s4834_s29 + $0x380] sm:$0xff]   ;;  %v4594_v14 = vld [vmem:[%s4834_s29 + $0x348] sm:$0xff]   ;;  %v4598_v38 = vld [vmem:[%s4834_s29 + $0x350] sm:$0xff]  }
 0xf00   : > { %4188 = vmatpush3.bf16.msra.mxu0 %v4552_v49  ;;  %4210 = vmatpush3.bf16.msra.mxu1 %v4553_v50  ;;  %v4595_v36 = vld [vmem:[%s4834_s29 + $0x3c8] sm:$0xff]   ;;  %v4601_v39 = vld [vmem:[%s4834_s29 + $0x390] sm:$0xff]   ;;  %v4602_v40 = vld [vmem:[%s4834_s29 + $0x358] sm:$0xff]  }
 0xf01   : > { %4189 = vmatprep.subr.bf16.mxu0 %v4554_v51  ;;  %4211 = vmatprep.subr.bf16.mxu1 %v4555_v52  ;;  %v4596_v37 = vld [vmem:[%s4834_s29 + $0x308] sm:$0xff]   ;;  %v4603_v41 = vld [vmem:[%s4834_s29 + $0x3d8] sm:$0xff]   ;;  %v4606_v11 = vld [vmem:[%s4834_s29 + $0x360] sm:$0xff]  }
 0xf02   : > { %v4597_v31 = vld [vmem:[%s4834_s29 + $0x388] sm:$0xff]   ;;  %v4604_v30 = vld [vmem:[%s4834_s29 + $0x318] sm:$0xff]   ;;  %v4607_v42 = vld [vmem:[%s4834_s29 + $0x3e0] sm:$0xff]  }
 0xf03   : > { %v4605_v6 = vld [vmem:[%s4834_s29 + $0x398] sm:$0xff]   ;;  %v4608_v43 = vld [vmem:[%s4834_s29 + $0x320] sm:$0xff]   ;;  %v4612_v49 = vld [vmem:[%s4834_s29 + $0x328] sm:$0xff]  }
 0xf04   : > { %4190 = vmatpush3.bf16.msra.mxu0 %v4556_v53  ;;  %4212 = vmatpush3.bf16.msra.mxu1 %v4557_v56  ;;  %v4609_v44 = vld [vmem:[%s4834_s29 + $0x3a0] sm:$0xff]   ;;  %v4613_v50 = vld [vmem:[%s4834_s29 + $0x3a8] sm:$0xff]   ;;  %v4614_v51 = vld [vmem:[%s4834_s29 + $0x370] sm:$0xff]  }
 0xf05   : > { %4219 = vmatprep.subr.bf16.mxu0 %v4558_v57  ;;  %4241 = vmatprep.subr.bf16.mxu1 %v4559_v59  ;;  %v4615_v52 = vld [vmem:[%s4834_s29 + $0x3f0] sm:$0xff]   ;;  %v4618_v57 = vld [vmem:[%s4834_s29 + $0x378] sm:$0xff]  }
 0xf06   : > { %v4616_v53 = vld [vmem:[%s4834_s29 + $0x330] sm:$0xff]   ;;  %v4619_v59 = vld [vmem:[%s4834_s29 + $0x3f8] sm:$0xff]  }
 0xf07   : > { %3447 = vmatmul.mubr.bf16.vlgmr.msra.gmra.mrb[56].mxu0 %v5173_v34  ;;  %3488 = vmatmul.mubr.bf16.vlgmr.msra.gmra.mrb[56].mxu1 %v5175_v35  ;;  %v4567_v34 = vld [vmem:[%s4834_s29 + $0x2d0] sm:$0xff]  }
 0xf08   : > { %4220 = vmatpush3.bf16.msra.mxu0 %v4560_v12  ;;  %3528 = vmatprep.mubr.bf16.mxu0 %v5198_v5  ;;  %v4568_v35 = vld [vmem:[%s4834_s29 + $0x210] sm:$0xff]   ;;  %v4574_v5 = vld [vmem:[%s4834_s29 + $0x260] sm:$0xff]   ;;  %v4620_v12 = vld [vmem:[%s4834_s29 + $0x338] sm:$0xff]  }
 0xf09   : > { %4242 = vmatpush3.bf16.msra.mxu1 %v4561_v60  ;;  %3569 = vmatprep.mubr.bf16.mxu1 %v5200_v19  ;;  %v4575_v19 = vld [vmem:[%s4834_s29 + $0x2e0] sm:$0xff]   ;;  %v4617_v56 = vld [vmem:[%s4834_s29 + $0x3b0] sm:$0xff]   ;;  %v4621_v60 = vld [vmem:[%s4834_s29 + $0x3b8] sm:$0xff]  }
 0xf0a   : > { %4221 = vmatprep.subr.bf16.mxu0 %v4562_v7  ;;  %4243 = vmatprep.subr.bf16.mxu1 %v4563_v61 }
 0xf0c   : > { %4222 = vmatpush3.bf16.msra.mxu0 %v4564_v0  ;;  %v3947_v0 = vld [vmem:[%s4849_s16 + $0x1] ss:$0 sm:$0xff] }
 0xf0d   : > { %4244 = vmatpush3.bf16.msra.mxu1 %v4565_v1  ;;  %4223 = vmatprep.subr.bf16.mxu0 %v4566_v15 }
 0xf0e   : > { %4245 = vmatprep.subr.bf16.mxu1 %v4567_v34 }
 0xf10   : > { %4224 = vmatpush3.bf16.msra.mxu0 %v4568_v35 }
 0xf11   : > { %4246 = vmatpush3.bf16.msra.mxu1 %v4569_v18  ;;  %4225 = vmatprep.subr.bf16.mxu0 %v4570_v2 }
 0xf12   : > { %4247 = vmatprep.subr.bf16.mxu1 %v4571_v4 }
 0xf14   : > { %4226 = vmatpush3.bf16.msra.mxu0 %v4572_v10 }
 0xf15   : > { %4248 = vmatpush3.bf16.msra.mxu1 %v4573_v21  ;;  %4227 = vmatprep.subr.bf16.mxu0 %v4574_v5 }
 0xf16   : > { %4249 = vmatprep.subr.bf16.mxu1 %v4575_v19 }
 0xf18   : > { %4228 = vmatpush3.bf16.msra.mxu0 %v4576_v62 }
 0xf19   : > { %4250 = vmatpush3.bf16.msra.mxu1 %v4577_v63  ;;  %4229 = vmatprep.subr.bf16.mxu0 %v4578_v8 }
 0xf1a   : > { %4251 = vmatprep.subr.bf16.mxu1 %v4579_v16 }
 0xf1c   : > { %4230 = vmatpush3.bf16.msra.mxu0 %v4580_v17 }
 0xf1d   : > { %4252 = vmatpush3.bf16.msra.mxu1 %v4581_v20  ;;  %4231 = vmatprep.subr.bf16.mxu0 %v4582_v22 }
 0xf1e   : > { %4253 = vmatprep.subr.bf16.mxu1 %v4583_v9 }
 0xf20   : > { %4232 = vmatpush3.bf16.msra.mxu0 %v4584_v23 }
 0xf21   : > { %4254 = vmatpush3.bf16.msra.mxu1 %v4585_v25  ;;  %4233 = vmatprep.subr.bf16.mxu0 %v4586_v24 }
 0xf22   : > { %4255 = vmatprep.subr.bf16.mxu1 %v4587_v26 }
 0xf24   : > { %4234 = vmatpush3.bf16.msra.mxu0 %v4588_v27 }
 0xf25   : > { %4256 = vmatpush3.bf16.msra.mxu1 %v4589_v13  ;;  %4263 = vmatprep.subr.bf16.mxu0 %v4590_v28 }
 0xf26   : > { %4285 = vmatprep.subr.bf16.mxu1 %v4591_v32 }
 0xf27   : > { %3529 = vmatmul.mubr.bf16.vlgmr.msra.gmra.mrb[60].mxu0 %v5194_v58  ;;  %v4599_v58 = vld [vmem:[%s4834_s29 + $0x3d0] sm:$0xff]  }
 0xf28   : > { %3570 = vmatmul.mubr.bf16.vlgmr.msra.gmra.mrb[60].mxu1 %v5196_v3  ;;  %4264 = vmatpush3.bf16.msra.mxu0 %v4592_v29  ;;  %v4600_v3 = vld [vmem:[%s4834_s29 + $0x310] sm:$0xff]  }
 0xf29   : > { %3610 = vmatprep.mubr.bf16.mxu0 %v5216_v47  ;;  %4286 = vmatpush3.bf16.msra.mxu1 %v4593_v33  ;;  %v4610_v47 = vld [vmem:[%s4834_s29 + $0x368] sm:$0xff]  }
 0xf2a   : > { %3651 = vmatprep.mubr.bf16.mxu1 %v5218_v48  ;;  %4265 = vmatprep.subr.bf16.mxu0 %v4594_v14  ;;  %v4611_v48 = vld [vmem:[%s4834_s29 + $0x3e8] sm:$0xff]  }
 0xf2b   : > { %4287 = vmatprep.subr.bf16.mxu1 %v4595_v36 }
 0xf2c   : > { %4266 = vmatpush3.bf16.msra.mxu0 %v4596_v37 }
 0xf2d   : > { %4288 = vmatpush3.bf16.msra.mxu1 %v4597_v31  ;;  %4267 = vmatprep.subr.bf16.mxu0 %v4598_v38 }
 0xf2e   : > { %4289 = vmatprep.subr.bf16.mxu1 %v4599_v58 }
 0xf30   : > { %4268 = vmatpush3.bf16.msra.mxu0 %v4600_v3 }
 0xf31   : > { %4290 = vmatpush3.bf16.msra.mxu1 %v4601_v39  ;;  %4269 = vmatprep.subr.bf16.mxu0 %v4602_v40 }
 0xf32   : > { %4291 = vmatprep.subr.bf16.mxu1 %v4603_v41 }
 0xf34   : > { %4270 = vmatpush3.bf16.msra.mxu0 %v4604_v30 }
 0xf35   : > { %4292 = vmatpush3.bf16.msra.mxu1 %v4605_v6  ;;  %4271 = vmatprep.subr.bf16.mxu0 %v4606_v11 }
 0xf36   : > { %4293 = vmatprep.subr.bf16.mxu1 %v4607_v42 }
 0xf38   : > { %4272 = vmatpush3.bf16.msra.mxu0 %v4608_v43 }
 0xf39   : > { %4294 = vmatpush3.bf16.msra.mxu1 %v4609_v44  ;;  %4273 = vmatprep.subr.bf16.mxu0 %v4610_v47 }
 0xf3a   : > { %4295 = vmatprep.subr.bf16.mxu1 %v4611_v48 }
 0xf3c   : > { %4274 = vmatpush3.bf16.msra.mxu0 %v4612_v49 }
 0xf3d   : > { %4296 = vmatpush3.bf16.msra.mxu1 %v4613_v50  ;;  %4275 = vmatprep.subr.bf16.mxu0 %v4614_v51 }
 0xf3e   : > { %4297 = vmatprep.subr.bf16.mxu1 %v4615_v52 }
 0xf40   : > { %4276 = vmatpush3.bf16.msra.mxu0 %v4616_v53 }
 0xf41   : > { %4298 = vmatpush3.bf16.msra.mxu1 %v4617_v56  ;;  %4277 = vmatprep.subr.bf16.mxu0 %v4618_v57 }
 0xf42   : > { %4299 = vmatprep.subr.bf16.mxu1 %v4619_v59 }
 0xf44   : > { %4278 = vmatpush3.bf16.msra.mxu0 %v4620_v12 }
 0xf45   : > { %4300 = vmatpush3.bf16.msra.mxu1 %v4621_v60 }
 0xf47   : > { %3611 = vmatmul.mubr.bf16.vlgmr.msra.gmra.mrb[64].mxu0 %v5212_v45 }
 0xf48   : > { %3652 = vmatmul.mubr.bf16.vlgmr.msra.gmra.mrb[64].mxu1 %v5214_v46 }
 0xfba   : > { %v4147_v7 = vpop.f32.mrb[52].mxu0  ;;  %v4169_v61 = vpop.f32.mrb[52].mxu1 }
 0xfbb   : > { %v4148_v1 = vpop.f32.mrb[53].mxu0  ;;  %v4170_v15 = vpop.f32.mrb[53].mxu1 }
 0xfbc   : > { %v4149_v34 = vadd.f32 %v4148_v1, %v4147_v7  ;;  %v4171_v35 = vadd.f32 %v4170_v15, %v4169_v61  ;;  %v4150_v18 = vpop.f32.mrb[54].mxu0  ;;  %v4172_v2 = vpop.f32.mrb[54].mxu1 }
 0xfbd   : > { %v4151_v4 = vpop.f32.mrb[55].mxu0  ;;  %v4173_v10 = vpop.f32.mrb[55].mxu1 }
 0xfbe   : > { %v3367_v21 = vadd.f32 %v4149_v34, %v3947_v0  ;;  %v4152_v5 = vadd.f32 %v4151_v4, %v4150_v18  ;;  %v4174_v19 = vadd.f32 %v4173_v10, %v4172_v2 }
 0xfc0   : > { %v3408_v62 = vadd.f32 %v4171_v35, %v3367_v21  ;;  %v3370_v63 = vadd.f32 %v4152_v5, %v3947_v0 }
 0xfc2   : > { %v3411_v8 = vadd.f32 %v4174_v19, %v3370_v63 }
 0xfda   : > { %v4191_v45 = vpop.f32.mrb[56].mxu0  ;;  %v4213_v16 = vpop.f32.mrb[56].mxu1 }
 0xfdb   : > { %v4192_v46 = vpop.f32.mrb[57].mxu0  ;;  %v4214_v17 = vpop.f32.mrb[57].mxu1 }
 0xfdc   : > { %v4193_v20 = vadd.f32 %v4192_v46, %v4191_v45  ;;  %v4215_v22 = vadd.f32 %v4214_v17, %v4213_v16  ;;  %v4194_v9 = vpop.f32.mrb[58].mxu0  ;;  %v4216_v23 = vpop.f32.mrb[58].mxu1 }
 0xfdd   : > { %v4195_v25 = vpop.f32.mrb[59].mxu0  ;;  %v4217_v24 = vpop.f32.mrb[59].mxu1 }
 0xfde   : > { %v3449_v26 = vadd.f32 %v4193_v20, %v3408_v62  ;;  %v4196_v27 = vadd.f32 %v4195_v25, %v4194_v9  ;;  %v4218_v13 = vadd.f32 %v4217_v24, %v4216_v23  ;;  %v4077_v25 = vld [vmem:[%s4849_s16 + $0x5] ss:$0 sm:$0xff] }
 0xfe0   : > { %v3490_v28 = vadd.f32 %v4215_v22, %v3449_v26  ;;  %v3452_v32 = vadd.f32 %v4196_v27, %v3411_v8  ;;  %v4076_v22 = vld [vmem:[%s4849_s16 + $0x4] ss:$0 sm:$0xff] }
 0xfe2   : > { %v3493_v29 = vadd.f32 %v4218_v13, %v3452_v32 }
 0xffa   : > { %v4235_v33 = vpop.f32.mrb[60].mxu0 }
 0xffb   : > { %v4257_v14 = vpop.f32.mrb[60].mxu1  ;;  %v4236_v36 = vpop.f32.mrb[61].mxu0 }
 0xffc   : > { %v4237_v37 = vadd.f32 %v4236_v36, %v4235_v33  ;;  %v4258_v31 = vpop.f32.mrb[61].mxu1  ;;  %v4238_v38 = vpop.f32.mrb[62].mxu0 }
 0xffd   : > { %v4259_v58 = vadd.f32 %v4258_v31, %v4257_v14  ;;  %v4260_v3 = vpop.f32.mrb[62].mxu1  ;;  %v4239_v39 = vpop.f32.mrb[63].mxu0 }
 0xffe   : > { %v3531_v40 = vadd.f32 %v4237_v37, %v3490_v28  ;;  %v4240_v41 = vadd.f32 %v4239_v39, %v4238_v38  ;;  %v4261_v30 = vpop.f32.mrb[63].mxu1 }
 0xfff   : > { %v4262_v6 = vadd.f32 %v4261_v30, %v4260_v3 }
0x1000   : > { %v3572_v11 = vadd.f32 %v4259_v58, %v3531_v40  ;;  %v3534_v42 = vadd.f32 %v4240_v41, %v3493_v29 }
0x1002   : > { %v3575_v43 = vadd.f32 %v4262_v6, %v3534_v42 }
0x101a   : > { %v4279_v44 = vpop.f32.mrb[64].mxu0 }
0x101b   : > { %v4301_v47 = vpop.f32.mrb[64].mxu1  ;;  %v4280_v48 = vpop.f32.mrb[65].mxu0 }
0x101c   : > { %v4281_v49 = vadd.f32 %v4280_v48, %v4279_v44  ;;  %v4302_v50 = vpop.f32.mrb[65].mxu1  ;;  %v4282_v51 = vpop.f32.mrb[66].mxu0 }
0x101d   : > { %v4303_v52 = vadd.f32 %v4302_v50, %v4301_v47  ;;  %v4304_v53 = vpop.f32.mrb[66].mxu1  ;;  %v4283_v56 = vpop.f32.mrb[67].mxu0 }
0x101e   : > { %v3613_v57 = vadd.f32 %v4281_v49, %v3572_v11  ;;  %v4284_v59 = vadd.f32 %v4283_v56, %v4282_v51  ;;  %v4305_v12 = vpop.f32.mrb[67].mxu1 }
0x101f   : > { %v4306_v60 = vadd.f32 %v4305_v12, %v4304_v53 }
0x1020   : > { %v3654_v7 = vadd.f32 %v4303_v52, %v3613_v57  ;;  %v3616_v61 = vadd.f32 %v4284_v59, %v3575_v43 }
0x1022   : > { %v3657_v0 = vadd.f32 %v4306_v60, %v3616_v61  ;;  %v3660_v1 = vadd.f32 %v3654_v7, %v5050_v54 }
0x1024   : > { %v3664_v15 = vsel %vm553_vm5, %v3660_v1, 0.0  ;;  %v3661_v34 = vadd.f32 %v3657_v0, %v5052_v55 }
0x1025   : > { %3665 = vadd.xlane.f32.xlu0 %v3664_v15 }
0x1026   : > { %v3667_v35 = vsel %vm553_vm5, %v3661_v34, 0.0 }
0x1027   : > { %3668 = vadd.xlane.f32.xlu1 %v3667_v35 }
0x10b2   : > { %v3666_v18 = vpop.xlane.xlu0 %3665 }
0x10b3   : > { %v3670_v2 = vmul.f32 0.03125, %v3666_v18 }
0x10b4   : > { %v3669_v4 = vpop.xlane.xlu1 %3668 }
0x10b5   : > { %v3672_v10 = vsub.f32 %v3660_v1, %v3670_v2  ;;  %v3671_v21 = vmul.f32 0.03125, %v3669_v4 }
0x10b7   : > { %v3673_v5 = vsub.f32 %v3661_v34, %v3671_v21  ;;  %v3674_v19 = vmul.f32 %v3672_v10, %v3672_v10 }
0x10b9   : > { %v3676_v62 = vsel %vm553_vm5, %v3674_v19, 0.0  ;;  %v3675_v63 = vmul.f32 %v3673_v5, %v3673_v5 }
0x10ba   : > { %3677 = vadd.xlane.f32.xlu0 %v3676_v62 }
0x10bb   : > { %v3679_v54 = vsel %vm553_vm5, %v3675_v63, 0.0 }
0x10bc   : > { %3680 = vadd.xlane.f32.xlu1 %v3679_v54 }
0x1147   : > { %v3678_v55 = vpop.xlane.xlu0 %3677 }
0x1148   : > { %v3682_v8 = vmul.f32 0.03125, %v3678_v55 }
0x1149   : > { %v3681_v45 = vpop.xlane.xlu1 %3680 }
0x114a   : > { %v3684_v16 = vadd.f32 1e-05, %v3682_v8  ;;  %v3683_v46 = vmul.f32 0.03125, %v3681_v45 }
0x114c   : > { %4658 = vrsqrt.f32 %v3684_v16  ;;  %v3685_v17 = vadd.f32 1e-05, %v3683_v46 }
0x114e   : > { %4660 = vrsqrt.f32 %v3685_v17 }
0x1156   : > { %v4659_v20 = vpop.eup %4658 }
0x1157   : > { %v3688_v9 = vmul.f32 %v4659_v20, %v3672_v10 }
0x1158   : > { %v4661_v23 = vpop.eup %4660 }
0x1159   : > { %v3694_v24 = vmul.f32 %v4076_v22, %v3688_v9  ;;  %v3689_v26 = vmul.f32 %v4661_v23, %v3673_v5  ;;  %3707 = sbr.rel (%p4078_p6) target bundleno = 4450 (0x1162), region = 64 }
0x115b   : > { %v3700_v27 = vadd.f32 %v4077_v25, %v3694_v24  ;;  %v3695_v13 = vmul.f32 %v4076_v22, %v3689_v26 }
0x115d   : > { %3702 = vst.msk [vmem:[#allocation2] sm:$0xff] %vm553_vm5, %v3700_v27  ;;  %v3701_v28 = vadd.f32 %v4077_v25, %v3695_v13 }
0x115e   : > { %3714 = vst.msk [vmem:[#allocation3 - $0x7] sm:$0x80] (!%p4078_p6), %vm3713_vm10, %v3700_v27 }
0x115f   : > { %3703 = vst.msk [vmem:[#allocation2 + $0x8] sm:$0xff] %vm553_vm5, %v3701_v28  ;;  %v3710_v32 = vrot.slane (!%p4078_p6), %v3701_v28, 7 }
0x1161   : > { %3716 = vst.msk [vmem:[#allocation3 + $0x1] sm:$0x1] %vm3715_vm11, %v3710_v32 }
0x1162 PF: > { %s5364_s22 = sadd.s32 4294967295, %s4716_s11   ;;  %s4737_s29 = smov [#allocation3]  }
0x1163   : > { %p5314_p7 = scmp.eq.s32.totalorder %s5364_s22, 1  ;;  %s3726_s20 = sshll.u32 %s4737_s29, 4  ;;  %s3727_s20 = int_to_ptr.vmem [resolvable:$true] %s3726_s20 }
0x1164   : > { %s4664_s16 = scalar_lea.vmem %s3727_s20, 32  ;;  %p4671_p11 = scmp.lt.s32.totalorder %s3727_s20, %s3727_s20 }
0x1165   : > { %p4665_p8 = scmp.ne.s32.totalorder %s3727_s20, %s4664_s16  ;;  %p4672_p12 = scmp.lt.s32.totalorder %s4664_s16, %s4664_s16 }
0x1167   : > { %p4666_p9 = pnand %p4665_p8, %p5314_p7  ;;  %p4673_p13 = por %p4672_p12, %p4671_p11 }
0x1169   : > { %p4667_p10 = pneg %p4666_p9 }
0x116b   : > { %p4674_p0 = pnand %p4673_p13, %p4667_p10 }
0x116d   : > { %4677 = shalt.err (!%p4674_p0)
}
0x116e   : > { %s4678_s19 = scalar_lea.hbm %s5358_s9, 32 }
0x116f   : > { %p4679_p1 = scmp.ne.s32.totalorder %s5358_s9, %s4678_s19  ;;  %p4684_p4 = scmp.lt.u32.totalorder %s4678_s19, %s5358_s9 }
0x1171   : > { %p4680_p2 = pnand %p4679_p1, %p5314_p7 }
0x1173   : > { %p4681_p3 = pneg %p4680_p2 }
0x1175   : > { %p4686_p5 = pnand %p4684_p4, %p4681_p3 }
0x1177   : > { %4689 = shalt.err (!%p4686_p5)
}
0x1178   : > { %4426 = dma.vmem_to_hbm [thread:$0]  (%p5314_p7), %s3727_s20, 32, %s5358_s9, [#allocation4]  }
0x1179   : > { %4703 = dma.done.wait (%p5314_p7), [#allocation4], 32  }
0x117a   : > { %4705 = vsyncadd (%p5314_p7), [#allocation4], 4294967264 }
0x117b PF: > { %s20_s11 = sadd.s32 1, %s4716_s11   ;;  %s5366_s24 = sld [smem:[#allocation6_spill]] }
0x117c   : > { %p17_p6 = scmp.ge.s32.totalorder %s20_s11, 4   ;;  %s5367_s30 = smov %s4712_s10 }
0x117e   :  { %19 = sbr.rel (!%p17_p6) target bundleno = 5 (0x5), region = 113 }
0x1181   : > { %s5368_s10 = smov %s5366_s24 }
0x1185   :  { %3739 = vsyncpa [#allocation4], 1 }
0x1186   :  { %3741 = vsyncpa [#allocation4 + $0x1], 1 }

</bundles_post_ra>
